<compile_context>
chip_gen: v5e
topology: v5e:2x2
jax: 0.10.0
libtpu: 0.0.40
codegen_flags: <defaults>
</compile_context>

<pallas_src>
from functools import partial

import jax
import jax.numpy as jnp
from jax.experimental import pallas as pl
from jax.experimental.pallas import tpu as pltpu

_PAD = 8      # constant "ones" sublanes carried through the MLP (bias carriers)
_LANE = 128


def _round_up(x, m):
    return ((x + m - 1) // m) * m


def edge_decoder_kernel(row_ref, col_ref, zsrc_ref, zdst_ref, w_ref, wo_ref,
                        out_ref, *, num_layers, compute_dtype):
    """Fused one-hot gather + bias-augmented MLP + projection, transposed layout.

    row_ref : (1, TE)              int32 source-node index per edge (lanes = edges)
    col_ref : (1, TE)              int32 destination-node index per edge
    zsrc_ref: (H, N_src)           z_src.T
    zdst_ref: (H, N_dst)           z_dst.T
    w_ref   : (L, D+_PAD, D+_PAD)  augmented transposed MLP weights [[W_l.T, b_l|0],[0, I]]
    wo_ref  : (D+_PAD, 1)          output projection column, output bias folded in (f32)
    out_ref : (1, TE)              sigmoid probabilities, lane-dense
    """
    te = out_ref.shape[-1]
    n_src = zsrc_ref.shape[-1]
    n_dst = zdst_ref.shape[-1]

    # One-hot selectors built on the VPU (single cast bool -> compute dtype).
    src_iota = jax.lax.broadcasted_iota(jnp.int32, (n_src, te), 0)
    dst_iota = jax.lax.broadcasted_iota(jnp.int32, (n_dst, te), 0)
    oh_src = (src_iota == row_ref[...]).astype(compute_dtype)      # (N_src, TE)
    oh_dst = (dst_iota == col_ref[...]).astype(compute_dtype)      # (N_dst, TE)

    # Fused gather + concat as two half-size MXU matmuls, f32 accumulation.
    h_top = jnp.dot(zsrc_ref[...], oh_src, preferred_element_type=jnp.float32)  # (H, TE)
    h_bot = jnp.dot(zdst_ref[...], oh_dst, preferred_element_type=jnp.float32)  # (H, TE)
    pad = wo_ref.shape[0] - h_top.shape[0] - h_bot.shape[0]
    ones = jnp.ones((pad, te), jnp.float32)                        # bias-carrier rows
    h = jnp.concatenate([h_top, h_bot, ones], axis=0)              # (D+_PAD, TE) f32

    for l in range(num_layers):   # static unroll; biases ride inside the augmented matmul
        h = jnp.dot(w_ref[l], h.astype(compute_dtype),
                    preferred_element_type=jnp.float32)
        h = jnp.maximum(h, 0.0)   # ReLU keeps the ones rows at 1
        # TODO(synk): dropout (training mode, p>0) is intentionally not implemented.

    # Output projection (D -> 1): VPU multiply + sublane (XLU) reduce; MXU stays free.
    logits = jnp.sum(h * wo_ref[...], axis=0, keepdims=True)       # (1, TE)
    out_ref[...] = jax.nn.sigmoid(logits).astype(out_ref.dtype)


def edge_decoder_forward(z_dict, edge_label_index, params, *,
                         src_node_type="materials", dst_node_type="elements",
                         dropout=0.0, tile_e=2048, compute_dtype=jnp.float32):
    """Wrapper: operand prep + padding in JAX, fused gather/MLP/sigmoid in Pallas."""
    assert dropout == 0.0, "dropout > 0 (training mode) not implemented in the kernel"

    z_src = z_dict[src_node_type]
    z_dst = z_dict[dst_node_type]
    n_src, hidden = z_src.shape
    n_dst = z_dst.shape[0]
    D = 2 * hidden
    d_aug = D + _PAD

    row = edge_label_index[0].astype(jnp.int32)
    col = edge_label_index[1].astype(jnp.int32)
    E = int(row.shape[0])

    # Large edge tiles amortize the ~0.35us/step pipeline overhead, but keep at
    # least two tiles so v7x's two TensorCores both get work; lane dim stays a
    # multiple of 256.
    tile_e = max(256, min(_round_up(int(tile_e), 256), _round_up(pl.cdiv(E, 2), 256)))
    num_tiles = pl.cdiv(E, tile_e)
    e_pad = num_tiles * tile_e

    row_p = jnp.zeros((1, e_pad), jnp.int32).at[0, :E].set(row)    # tail padded with idx 0
    col_p = jnp.zeros((1, e_pad), jnp.int32).at[0, :E].set(col)

    # Node tables, transposed (features on sublanes) -- no block-diagonal zeros.
    zsrc_t = z_src.T.astype(compute_dtype)                         # (H, N_src)
    zdst_t = z_dst.T.astype(compute_dtype)                         # (H, N_dst)

    # Augmented transposed MLP weights: with s = [h; ones(_PAD)],
    #   relu(A_l @ s) == [relu(W_l.T @ h + b_l); ones(_PAD)].
    w_t = jnp.swapaxes(params["mlp_w"], 1, 2).astype(jnp.float32)  # (L, D, D) = W_l.T
    L = int(w_t.shape[0])
    w_aug = jnp.zeros((L, d_aug, d_aug), jnp.float32)
    w_aug = w_aug.at[:, :D, :D].set(w_t)
    w_aug = w_aug.at[:, :D, D].set(params["mlp_b"].astype(jnp.float32))
    w_aug = w_aug.at[:, D:, D:].set(
        jnp.broadcast_to(jnp.eye(_PAD, dtype=jnp.float32), (L, _PAD, _PAD)))
    w_aug = w_aug.astype(compute_dtype)

    # Output projection column with the scalar bias folded onto the ones rows.
    wo_aug = jnp.zeros((d_aug, 1), jnp.float32)
    wo_aug = wo_aug.at[:D, :].set(params["out_w"].astype(jnp.float32))
    wo_aug = wo_aug.at[D, 0].set(params["out_b"].astype(jnp.float32).reshape(()))

    # Explicit scoped-VMEM budget (v5e default scoped VMEM is only 16 MiB);
    # capped safely below v7x's 64 MiB physical VMEM.
    isz = jnp.dtype(compute_dtype).itemsize
    invariant_bytes = 2 * (   # budget as if double-buffered (fallback path)
        hidden * (_round_up(n_src, _LANE) + _round_up(n_dst, _LANE)) * isz
        + L * d_aug * _round_up(d_aug, _LANE) * isz
        + _round_up(d_aug, 8) * _LANE * 4)
    stream_bytes = 2 * 3 * 8 * tile_e * 4                          # row/col/out, 2-buffered
    live_bytes = (2 * (_round_up(n_src, 8) + _round_up(n_dst, 8))
                  + 4 * _round_up(d_aug, 8)) * tile_e * 4          # in-kernel intermediates
    vmem_limit = int(min(max(2 * (invariant_bytes + stream_bytes + live_bytes),
                             32 * 2**20), 56 * 2**20))

    kernel = partial(edge_decoder_kernel, num_layers=L, compute_dtype=compute_dtype)
    out_shape = jax.ShapeDtypeStruct((1, e_pad), jnp.float32)
    edge_spec = pl.BlockSpec((1, tile_e), lambda i: (0, i))        # lane-dense per-tile

    def _invariant_spec(shape, single_buffer):
        nd = len(shape)

        def index_map(i):
            return (0,) * nd

        if single_buffer:
            # Constant index_map across the grid -> double buffering is pure
            # VMEM waste; request a single buffer.
            return pl.BlockSpec(shape, index_map, pipeline_mode=pl.Buffered(1))
        return pl.BlockSpec(shape, index_map)

    def _run(single_buffer):
        return pl.pallas_call(
            kernel,
            out_shape=out_shape,
            grid=(num_tiles,),
            in_specs=[
                edge_spec,                                          # row indices
                edge_spec,                                          # col indices
                _invariant_spec((hidden, n_src), single_buffer),    # z_src.T
                _invariant_spec((hidden, n_dst), single_buffer),    # z_dst.T
                _invariant_spec((L, d_aug, d_aug), single_buffer),  # augmented weights
                _invariant_spec((d_aug, 1), single_buffer),         # projection column
            ],
            # TODO(synk): optionally pack 8 edge sub-tiles per step into an
            # (8, TE/8) output slab for fully vreg-dense stores (minor here).
            out_specs=edge_spec,
            compiler_params=pltpu.CompilerParams(
                dimension_semantics=("parallel",),
                vmem_limit_bytes=vmem_limit),
        )(row_p, col_p, zsrc_t, zdst_t, w_aug, wo_aug)

    try:
        out = _run(single_buffer=True)
    except Exception:
        # pipeline_mode=pl.Buffered(1) support varies across JAX builds; the
        # default double-buffered path is identical in semantics, just uses 2x
        # VMEM for the grid-invariant blocks.
        out = _run(single_buffer=False)

    return out.reshape(-1)[:E]   # (E,)


def _reference_forward(z_dict, edge_label_index, params,
                       src_node_type="materials", dst_node_type="elements"):
    """Pure-JAX reference mirroring the PyTorch module."""
    row, col = edge_label_index
    z = jnp.concatenate(
        [z_dict[src_node_type][row], z_dict[dst_node_type][col]], axis=-1
    ).astype(jnp.float32)
    for l in range(params["mlp_w"].shape[0]):
        z = jnp.maximum(z @ params["mlp_w"][l] + params["mlp_b"][l], 0.0)
    z = z @ params["out_w"] + params["out_b"]
    return jax.nn.sigmoid(z.reshape(-1))


def init_params(key, hidden_channels, num_layers=1):
    """Deterministic init matching torch.nn.Linear shapes (uniform +-1/sqrt(fan_in))."""
    D = 2 * hidden_channels
    k_mlp_w, k_mlp_b, k_out_w, k_out_b = jax.random.split(key, 4)
    bound = 1.0 / jnp.sqrt(jnp.float32(D))
    return {
        "mlp_w": jax.random.uniform(k_mlp_w, (num_layers, D, D), jnp.float32, -bound, bound),
        "mlp_b": jax.random.uniform(k_mlp_b, (num_layers, D), jnp.float32, -bound, bound),
        "out_w": jax.random.uniform(k_out_w, (D, 1), jnp.float32, -bound, bound),
        "out_b": jax.random.uniform(k_out_b, (1,), jnp.float32, -bound, bound),
    }


if __name__ == "__main__":
    hidden_channels = 32      # -> concat feature dim D = 64
    num_layers = 2
    num_src = 24              # "materials" nodes
    num_dst = 12              # "elements" nodes
    num_edges = 1000          # not a tile multiple -> exercises padding + >=2-tile clamp

    root = jax.random.PRNGKey(0)
    k_src, k_dst, k_row, k_col, k_par = jax.random.split(root, 5)

    z_dict = {
        "materials": jax.random.normal(k_src, (num_src, hidden_channels), jnp.float32),
        "elements": jax.random.normal(k_dst, (num_dst, hidden_channels), jnp.float32),
    }
    edge_label_index = jnp.stack([
        jax.random.randint(k_row, (num_edges,), 0, num_src, dtype=jnp.int32),
        jax.random.randint(k_col, (num_edges,), 0, num_dst, dtype=jnp.int32),
    ])

    params = init_params(k_par, hidden_channels, num_layers)

    # f32 path (faithful to the PyTorch module).
    out = edge_decoder_forward(z_dict, edge_label_index, params)
    out = jax.block_until_ready(out)
    ref = _reference_forward(z_dict, edge_label_index, params)
    assert out.shape == (num_edges,)
    assert jnp.allclose(out, ref, atol=1e-4, rtol=1e-4), "f32 kernel mismatch vs reference"

    # bf16 MXU path (v6e/v7x optimization); accumulation + epilogue stay in f32.
    out_bf16 = edge_decoder_forward(z_dict, edge_label_index, params,
                                    compute_dtype=jnp.bfloat16)
    out_bf16 = jax.block_until_ready(out_bf16)
    assert out_bf16.shape == (num_edges,)
    assert float(jnp.max(jnp.abs(out_bf16 - ref))) < 1e-1, "bf16 kernel grossly off vs reference"

    print("KERNEL_OK")
</pallas_src>

<mosaic_0001>
module attributes {stable_mosaic.version = 11 : i64} {
  func.func @edge_decoder_kernel(%arg0: i32, %arg1: memref<1x512xi32, #tpu.memory_space<vmem>>, %arg2: memref<1x512xi32, #tpu.memory_space<vmem>>, %arg3: memref<32x24xf32, #tpu.memory_space<vmem>>, %arg4: memref<32x12xf32, #tpu.memory_space<vmem>>, %arg5: memref<2x72x72xf32, #tpu.memory_space<vmem>>, %arg6: memref<72x1xf32, #tpu.memory_space<vmem>>, %arg7: memref<1x512xf32, #tpu.memory_space<vmem>>) attributes {dimension_semantics = [#tpu.dimension_semantics<parallel>], iteration_bounds = array<i64: 2>, scalar_prefetch = 0 : i64, scratch_operands = 0 : i64, tpu.core_type = #tpu.core_type<tc>, window_params = [{transform_indices = @transform_0, window_bounds = array<i64: 1, 512>}, {transform_indices = @transform_1, window_bounds = array<i64: 1, 512>}, {pipeline_mode = #tpu.pipeline_mode<synchronous>, transform_indices = @transform_2, window_bounds = array<i64: 32, 24>}, {pipeline_mode = #tpu.pipeline_mode<synchronous>, transform_indices = @transform_3, window_bounds = array<i64: 32, 12>}, {pipeline_mode = #tpu.pipeline_mode<synchronous>, transform_indices = @transform_4, window_bounds = array<i64: 2, 72, 72>}, {pipeline_mode = #tpu.pipeline_mode<synchronous>, transform_indices = @transform_5, window_bounds = array<i64: 72, 1>}, {transform_indices = @transform_6, window_bounds = array<i64: 1, 512>}]} {
    %0 = tpu.iota {dimensions = array<i32: 0>} : vector<24x512xi32>
    %1 = tpu.iota {dimensions = array<i32: 0>} : vector<12x512xi32>
    %c0 = arith.constant 0 : index
    %c0_0 = arith.constant 0 : index
    %2 = vector.load %arg1[%c0, %c0_0] : memref<1x512xi32, #tpu.memory_space<vmem>>, vector<1x512xi32>
    %3 = vector.broadcast %2 : vector<1x512xi32> to vector<24x512xi32>
    %4 = arith.cmpi eq, %0, %3 : vector<24x512xi32>
    %5 = arith.extui %4 : vector<24x512xi1> to vector<24x512xi32>
    %6 = arith.sitofp %5 : vector<24x512xi32> to vector<24x512xf32>
    %c0_1 = arith.constant 0 : index
    %c0_2 = arith.constant 0 : index
    %7 = vector.load %arg2[%c0_1, %c0_2] : memref<1x512xi32, #tpu.memory_space<vmem>>, vector<1x512xi32>
    %8 = vector.broadcast %7 : vector<1x512xi32> to vector<12x512xi32>
    %9 = arith.cmpi eq, %1, %8 : vector<12x512xi32>
    %10 = arith.extui %9 : vector<12x512xi1> to vector<12x512xi32>
    %11 = arith.sitofp %10 : vector<12x512xi32> to vector<12x512xf32>
    %c0_3 = arith.constant 0 : index
    %c0_4 = arith.constant 0 : index
    %12 = vector.load %arg3[%c0_3, %c0_4] : memref<32x24xf32, #tpu.memory_space<vmem>>, vector<32x24xf32>
    %cst = arith.constant dense<0.000000e+00> : vector<32x512xf32>
    %13 = tpu.matmul %12, %6, %cst {dimension_numbers = #tpu.dot_dimension_numbers<[1], [0], [0], [1], [0, 0, 1, 1], [], []>} : vector<32x24xf32>, vector<24x512xf32>, vector<32x512xf32> -> vector<32x512xf32>
    %c0_5 = arith.constant 0 : index
    %c0_6 = arith.constant 0 : index
    %14 = vector.load %arg4[%c0_5, %c0_6] : memref<32x12xf32, #tpu.memory_space<vmem>>, vector<32x12xf32>
    %cst_7 = arith.constant dense<0.000000e+00> : vector<32x512xf32>
    %15 = tpu.matmul %14, %11, %cst_7 {dimension_numbers = #tpu.dot_dimension_numbers<[1], [0], [0], [1], [0, 0, 1, 1], [], []>} : vector<32x12xf32>, vector<12x512xf32>, vector<32x512xf32> -> vector<32x512xf32>
    %cst_8 = arith.constant 1.000000e+00 : f32
    %16 = vector.broadcast %cst_8 : f32 to vector<8x512xf32>
    %17 = tpu.concatenate %13, %15, %16 in 0 : vector<32x512xf32>, vector<32x512xf32>, vector<8x512xf32> -> vector<72x512xf32>
    %c0_9 = arith.constant 0 : index
    %c0_10 = arith.constant 0 : index
    %c0_11 = arith.constant 0 : index
    %18 = vector.load %arg5[%c0_9, %c0_10, %c0_11] : memref<2x72x72xf32, #tpu.memory_space<vmem>>, vector<1x72x72xf32>
    %19 = vector.shape_cast %18 : vector<1x72x72xf32> to vector<72x72xf32>
    %cst_12 = arith.constant dense<0.000000e+00> : vector<72x512xf32>
    %20 = tpu.matmul %19, %17, %cst_12 {dimension_numbers = #tpu.dot_dimension_numbers<[1], [0], [0], [1], [0, 0, 1, 1], [], []>} : vector<72x72xf32>, vector<72x512xf32>, vector<72x512xf32> -> vector<72x512xf32>
    %cst_13 = arith.constant 0.000000e+00 : f32
    %21 = vector.broadcast %cst_13 : f32 to vector<72x512xf32>
    %22 = arith.maximumf %20, %21 : vector<72x512xf32>
    %c1 = arith.constant 1 : index
    %c0_14 = arith.constant 0 : index
    %c0_15 = arith.constant 0 : index
    %23 = vector.load %arg5[%c1, %c0_14, %c0_15] : memref<2x72x72xf32, #tpu.memory_space<vmem>>, vector<1x72x72xf32>
    %24 = vector.shape_cast %23 : vector<1x72x72xf32> to vector<72x72xf32>
    %cst_16 = arith.constant dense<0.000000e+00> : vector<72x512xf32>
    %25 = tpu.matmul %24, %22, %cst_16 {dimension_numbers = #tpu.dot_dimension_numbers<[1], [0], [0], [1], [0, 0, 1, 1], [], []>} : vector<72x72xf32>, vector<72x512xf32>, vector<72x512xf32> -> vector<72x512xf32>
    %cst_17 = arith.constant 0.000000e+00 : f32
    %26 = vector.broadcast %cst_17 : f32 to vector<72x512xf32>
    %27 = arith.maximumf %25, %26 : vector<72x512xf32>
    %c0_18 = arith.constant 0 : index
    %c0_19 = arith.constant 0 : index
    %28 = vector.load %arg6[%c0_18, %c0_19] : memref<72x1xf32, #tpu.memory_space<vmem>>, vector<72x1xf32>
    %29 = vector.broadcast %28 : vector<72x1xf32> to vector<72x512xf32>
    %30 = arith.mulf %27, %29 : vector<72x512xf32>
    %cst_20 = arith.constant dense<0.000000e+00> : vector<512xf32>
    %31 = vector.multi_reduction <add>, %30, %cst_20 [0] : vector<72x512xf32> to vector<512xf32>
    %32 = vector.shape_cast %31 : vector<512xf32> to vector<1x512xf32>
    %33 = arith.negf %32 : vector<1x512xf32>
    %34 = math.exp %33 : vector<1x512xf32>
    %cst_21 = arith.constant 1.000000e+00 : f32
    %35 = vector.broadcast %cst_21 : f32 to vector<1x512xf32>
    %36 = arith.addf %35, %34 : vector<1x512xf32>
    %37 = arith.divf %35, %36 : vector<1x512xf32>
    %c0_22 = arith.constant 0 : index
    %c0_23 = arith.constant 0 : index
    %38 = vector.load %arg7[%c0_22, %c0_23] : memref<1x512xf32, #tpu.memory_space<vmem>>, vector<1x512xf32>
    tpu.vector_store %arg7[%c0_22, %c0_23], %37 {strides = array<i32>} : memref<1x512xf32, #tpu.memory_space<vmem>>, vector<1x512xf32>,
    return
  }
  func.func @transform_0(%arg0: i32) -> (i32, i32) {
    %c0_i32 = arith.constant 0 : i32
    %c0_i32_0 = arith.constant 0 : i32
    return %c0_i32, %arg0 : i32, i32
  }
  func.func @transform_1(%arg0: i32) -> (i32, i32) {
    %c0_i32 = arith.constant 0 : i32
    %c0_i32_0 = arith.constant 0 : i32
    return %c0_i32, %arg0 : i32, i32
  }
  func.func @transform_2(%arg0: i32) -> (i32, i32) {
    %c0_i32 = arith.constant 0 : i32
    %c0_i32_0 = arith.constant 0 : i32
    %c0_i32_1 = arith.constant 0 : i32
    return %c0_i32, %c0_i32_0 : i32, i32
  }
  func.func @transform_3(%arg0: i32) -> (i32, i32) {
    %c0_i32 = arith.constant 0 : i32
    %c0_i32_0 = arith.constant 0 : i32
    %c0_i32_1 = arith.constant 0 : i32
    return %c0_i32, %c0_i32_0 : i32, i32
  }
  func.func @transform_4(%arg0: i32) -> (i32, i32, i32) {
    %c0_i32 = arith.constant 0 : i32
    %c0_i32_0 = arith.constant 0 : i32
    %c0_i32_1 = arith.constant 0 : i32
    %c0_i32_2 = arith.constant 0 : i32
    return %c0_i32, %c0_i32_0, %c0_i32_1 : i32, i32, i32
  }
  func.func @transform_5(%arg0: i32) -> (i32, i32) {
    %c0_i32 = arith.constant 0 : i32
    %c0_i32_0 = arith.constant 0 : i32
    %c0_i32_1 = arith.constant 0 : i32
    return %c0_i32, %c0_i32_0 : i32, i32
  }
  func.func @transform_6(%arg0: i32) -> (i32, i32) {
    %c0_i32 = arith.constant 0 : i32
    %c0_i32_0 = arith.constant 0 : i32
    return %c0_i32, %arg0 : i32, i32
  }
}

module attributes {stable_mosaic.version = 11 : i64} {
  func.func @edge_decoder_kernel(%arg0: i32, %arg1: memref<1x512xi32, #tpu.memory_space<vmem>>, %arg2: memref<1x512xi32, #tpu.memory_space<vmem>>, %arg3: memref<32x24xf32, #tpu.memory_space<vmem>>, %arg4: memref<32x12xf32, #tpu.memory_space<vmem>>, %arg5: memref<2x72x72xf32, #tpu.memory_space<vmem>>, %arg6: memref<72x1xf32, #tpu.memory_space<vmem>>, %arg7: memref<1x512xf32, #tpu.memory_space<vmem>>) attributes {dimension_semantics = [#tpu.dimension_semantics<parallel>], iteration_bounds = array<i64: 2>, scalar_prefetch = 0 : i64, scratch_operands = 0 : i64, tpu.core_type = #tpu.core_type<tc>, window_params = [{transform_indices = @transform_0, window_bounds = array<i64: 1, 512>}, {transform_indices = @transform_1, window_bounds = array<i64: 1, 512>}, {pipeline_mode = #tpu.pipeline_mode<synchronous>, transform_indices = @transform_2, window_bounds = array<i64: 32, 24>}, {pipeline_mode = #tpu.pipeline_mode<synchronous>, transform_indices = @transform_3, window_bounds = array<i64: 32, 12>}, {pipeline_mode = #tpu.pipeline_mode<synchronous>, transform_indices = @transform_4, window_bounds = array<i64: 2, 72, 72>}, {pipeline_mode = #tpu.pipeline_mode<synchronous>, transform_indices = @transform_5, window_bounds = array<i64: 72, 1>}, {transform_indices = @transform_6, window_bounds = array<i64: 1, 512>}]} {
    %0 = tpu.iota {dimensions = array<i32: 0>} : vector<24x512xi32>
    %1 = tpu.iota {dimensions = array<i32: 0>} : vector<12x512xi32>
    %c0 = arith.constant 0 : index
    %c0_0 = arith.constant 0 : index
    %2 = vector.load %arg1[%c0, %c0_0] : memref<1x512xi32, #tpu.memory_space<vmem>>, vector<1x512xi32>
    %3 = vector.broadcast %2 : vector<1x512xi32> to vector<24x512xi32>
    %4 = arith.cmpi eq, %0, %3 : vector<24x512xi32>
    %5 = arith.extui %4 : vector<24x512xi1> to vector<24x512xi32>
    %6 = arith.sitofp %5 : vector<24x512xi32> to vector<24x512xf32>
    %c0_1 = arith.constant 0 : index
    %c0_2 = arith.constant 0 : index
    %7 = vector.load %arg2[%c0_1, %c0_2] : memref<1x512xi32, #tpu.memory_space<vmem>>, vector<1x512xi32>
    %8 = vector.broadcast %7 : vector<1x512xi32> to vector<12x512xi32>
    %9 = arith.cmpi eq, %1, %8 : vector<12x512xi32>
    %10 = arith.extui %9 : vector<12x512xi1> to vector<12x512xi32>
    %11 = arith.sitofp %10 : vector<12x512xi32> to vector<12x512xf32>
    %c0_3 = arith.constant 0 : index
    %c0_4 = arith.constant 0 : index
    %12 = vector.load %arg3[%c0_3, %c0_4] : memref<32x24xf32, #tpu.memory_space<vmem>>, vector<32x24xf32>
    %cst = arith.constant dense<0.000000e+00> : vector<32x512xf32>
    %13 = tpu.matmul %12, %6, %cst {dimension_numbers = #tpu.dot_dimension_numbers<[1], [0], [0], [1], [0, 0, 1, 1], [], []>} : vector<32x24xf32>, vector<24x512xf32>, vector<32x512xf32> -> vector<32x512xf32>
    %c0_5 = arith.constant 0 : index
    %c0_6 = arith.constant 0 : index
    %14 = vector.load %arg4[%c0_5, %c0_6] : memref<32x12xf32, #tpu.memory_space<vmem>>, vector<32x12xf32>
    %cst_7 = arith.constant dense<0.000000e+00> : vector<32x512xf32>
    %15 = tpu.matmul %14, %11, %cst_7 {dimension_numbers = #tpu.dot_dimension_numbers<[1], [0], [0], [1], [0, 0, 1, 1], [], []>} : vector<32x12xf32>, vector<12x512xf32>, vector<32x512xf32> -> vector<32x512xf32>
    %cst_8 = arith.constant 1.000000e+00 : f32
    %16 = vector.broadcast %cst_8 : f32 to vector<8x512xf32>
    %17 = tpu.concatenate %13, %15, %16 in 0 : vector<32x512xf32>, vector<32x512xf32>, vector<8x512xf32> -> vector<72x512xf32>
    %c0_9 = arith.constant 0 : index
    %c0_10 = arith.constant 0 : index
    %c0_11 = arith.constant 0 : index
    %18 = vector.load %arg5[%c0_9, %c0_10, %c0_11] : memref<2x72x72xf32, #tpu.memory_space<vmem>>, vector<1x72x72xf32>
    %19 = vector.shape_cast %18 : vector<1x72x72xf32> to vector<72x72xf32>
    %cst_12 = arith.constant dense<0.000000e+00> : vector<72x512xf32>
    %20 = tpu.matmul %19, %17, %cst_12 {dimension_numbers = #tpu.dot_dimension_numbers<[1], [0], [0], [1], [0, 0, 1, 1], [], []>} : vector<72x72xf32>, vector<72x512xf32>, vector<72x512xf32> -> vector<72x512xf32>
    %cst_13 = arith.constant 0.000000e+00 : f32
    %21 = vector.broadcast %cst_13 : f32 to vector<72x512xf32>
    %22 = arith.maximumf %20, %21 : vector<72x512xf32>
    %c1 = arith.constant 1 : index
    %c0_14 = arith.constant 0 : index
    %c0_15 = arith.constant 0 : index
    %23 = vector.load %arg5[%c1, %c0_14, %c0_15] : memref<2x72x72xf32, #tpu.memory_space<vmem>>, vector<1x72x72xf32>
    %24 = vector.shape_cast %23 : vector<1x72x72xf32> to vector<72x72xf32>
    %cst_16 = arith.constant dense<0.000000e+00> : vector<72x512xf32>
    %25 = tpu.matmul %24, %22, %cst_16 {dimension_numbers = #tpu.dot_dimension_numbers<[1], [0], [0], [1], [0, 0, 1, 1], [], []>} : vector<72x72xf32>, vector<72x512xf32>, vector<72x512xf32> -> vector<72x512xf32>
    %cst_17 = arith.constant 0.000000e+00 : f32
    %26 = vector.broadcast %cst_17 : f32 to vector<72x512xf32>
    %27 = arith.maximumf %25, %26 : vector<72x512xf32>
    %c0_18 = arith.constant 0 : index
    %c0_19 = arith.constant 0 : index
    %28 = vector.load %arg6[%c0_18, %c0_19] : memref<72x1xf32, #tpu.memory_space<vmem>>, vector<72x1xf32>
    %29 = vector.broadcast %28 : vector<72x1xf32> to vector<72x512xf32>
    %30 = arith.mulf %27, %29 : vector<72x512xf32>
    %cst_20 = arith.constant dense<0.000000e+00> : vector<512xf32>
    %31 = vector.multi_reduction <add>, %30, %cst_20 [0] : vector<72x512xf32> to vector<512xf32>
    %32 = vector.shape_cast %31 : vector<512xf32> to vector<1x512xf32>
    %33 = arith.negf %32 : vector<1x512xf32>
    %34 = math.exp %33 : vector<1x512xf32>
    %cst_21 = arith.constant 1.000000e+00 : f32
    %35 = vector.broadcast %cst_21 : f32 to vector<1x512xf32>
    %36 = arith.addf %35, %34 : vector<1x512xf32>
    %37 = arith.divf %35, %36 : vector<1x512xf32>
    %c0_22 = arith.constant 0 : index
    %c0_23 = arith.constant 0 : index
    %38 = vector.load %arg7[%c0_22, %c0_23] : memref<1x512xf32, #tpu.memory_space<vmem>>, vector<1x512xf32>
    tpu.vector_store %arg7[%c0_22, %c0_23], %37 {strides = array<i32>} : memref<1x512xf32, #tpu.memory_space<vmem>>, vector<1x512xf32>,
    return
  }
  func.func @transform_0(%arg0: i32) -> (i32, i32) {
    %c0_i32 = arith.constant 0 : i32
    %c0_i32_0 = arith.constant 0 : i32
    return %c0_i32, %arg0 : i32, i32
  }
  func.func @transform_1(%arg0: i32) -> (i32, i32) {
    %c0_i32 = arith.constant 0 : i32
    %c0_i32_0 = arith.constant 0 : i32
    return %c0_i32, %arg0 : i32, i32
  }
  func.func @transform_2(%arg0: i32) -> (i32, i32) {
    %c0_i32 = arith.constant 0 : i32
    %c0_i32_0 = arith.constant 0 : i32
    %c0_i32_1 = arith.constant 0 : i32
    return %c0_i32, %c0_i32_0 : i32, i32
  }
  func.func @transform_3(%arg0: i32) -> (i32, i32) {
    %c0_i32 = arith.constant 0 : i32
    %c0_i32_0 = arith.constant 0 : i32
    %c0_i32_1 = arith.constant 0 : i32
    return %c0_i32, %c0_i32_0 : i32, i32
  }
  func.func @transform_4(%arg0: i32) -> (i32, i32, i32) {
    %c0_i32 = arith.constant 0 : i32
    %c0_i32_0 = arith.constant 0 : i32
    %c0_i32_1 = arith.constant 0 : i32
    %c0_i32_2 = arith.constant 0 : i32
    return %c0_i32, %c0_i32_0, %c0_i32_1 : i32, i32, i32
  }
  func.func @transform_5(%arg0: i32) -> (i32, i32) {
    %c0_i32 = arith.constant 0 : i32
    %c0_i32_0 = arith.constant 0 : i32
    %c0_i32_1 = arith.constant 0 : i32
    return %c0_i32, %c0_i32_0 : i32, i32
  }
  func.func @transform_6(%arg0: i32) -> (i32, i32) {
    %c0_i32 = arith.constant 0 : i32
    %c0_i32_0 = arith.constant 0 : i32
    return %c0_i32, %arg0 : i32, i32
  }
}

</mosaic_0001>

<bundles_post_ra>
// kernel: tpu_custom_call.1
= control target key start
LH: loop header
LB: loop body
LE: loop exit
PB: predicated region body
PF: predicated region fallthrough
CT: control target
= control target key end

     0   :  { %11 = vsyncpa [#allocation3], 0  ;;  %s2302_s0 = inlined_call_operand.vmem [shape: s32[1,1024], index: 0, kind: input, shape index: {}]   ;;  %s2303_s1 = inlined_call_operand.vmem [shape: s32[1,1024], index: 1, kind: input, shape index: {}]   ;;  %s2304_s2 = inlined_call_operand.vmem [shape: f32[32,24], index: 2, kind: input, shape index: {}]   ;;  %s2305_s3 = inlined_call_operand.vmem [shape: f32[32,12], index: 3, kind: input, shape index: {}]   ;;  %s2306_s4 = inlined_call_operand.hbm [shape: f32[2,72,72], index: 4, kind: input, shape index: {}]   ;;  %s2307_s5 = inlined_call_operand.vmem [shape: f32[72,1], index: 5, kind: input, shape index: {}]   ;;  %s2308_s6 = inlined_call_operand.hbm [shape: f32[1,1024], index: 6, kind: output, shape index: {}]  }
   0x1   :  { %12 = vsyncpa [#allocation4], 0 }
   0x2   :  { %14 = vsyncpa [#allocation4 + $0x1], 0  ;;  %s1845_s21 = smov 0   ;;  %s1847_s22 = smov 0  }
   0x3   :  { %s1849_s23 = smov 0   ;;  %s1851_s24 = smov 0  }
   0x4 LB: > { %s1866_s25 = sadd.s32 4294967295, %s1802_s24   ;;  %s1471_s26 = sadd.s32 4294967294, %s1802_s24   ;;  %s1802_s24 = sphi %s1851_s24, %s2318_s24   ;;  %s1798_s23 = sphi %s1849_s23, %s2317_s23   ;;  %s1794_s22 = sphi %s1847_s22, %s2316_s22   ;;  %s1790_s21 = sphi %s1845_s21, %s2315_s21  }
   0x5   : > { %s1870_s27 = sadd.s32 1, %s1802_s24   ;;  %s163_s28 = sadd.s32 1, %s1798_s23 }
   0x6   : > { %s160_s29 = ssub.s32 %s1802_s24, %s1870_s27  ;;  %p173_p0 = scmp.ne.s32.totalorder %s1798_s23, %s1794_s22 }
   0x7   : > { %p161_p1 = scmp.eq.s32.totalorder %s160_s29, 0  ;;  %p174_p2 = scmp.eq.s32.totalorder %s1866_s25, 1 }
   0x8   : > { %p179_p3 = scmp.ne.s32.totalorder %s1794_s22, %s1790_s21  ;;  %p180_p4 = scmp.eq.s32.totalorder %s1471_s26, 1 }
   0x9   : > { %s1881_s30 = scalar_select %p161_p1, %s1798_s23, %s163_s28  }
   0xa   : > { %p1883_p5 = por %p174_p2, %p173_p0  ;;  %p1887_p6 = por %p180_p4, %p179_p3 }
   0xb   : > { %p1472_p7 = scmp.ge.s32.totalorder %s1802_s24, 1  ;;  %p187_p8 = scmp.lt.s32.totalorder %s1802_s24, 3 }
   0xc   : > { %p1646_p9 = scmp.eq.s32.totalorder %s1866_s25, 0  ;;  %s204_s11 = sshll.u32 %s2306_s4, 4  ;;  %s205_s11 = int_to_ptr.hbm [resolvable:$true] %s204_s11 }
   0xd   : > { %p188_p10 = pnand %p1472_p7, %p187_p8  ;;  %s1804_s12 = smov [#allocation2]  }
   0xe   : > { %s206_s13 = sshll.u32 %s1804_s12, 4  ;;  %s1805_s14 = smov 128   ;;  %s207_s13 = int_to_ptr.vmem [resolvable:$true] %s206_s13 }
   0xf   : > { %p1638_p11 = pneg %p188_p10  ;;  %s1806_s15 = smov 8  }
  0x10   : > { %241 = sbr.rel (%p188_p10) target bundleno = 708 (0x2c4), region = 44 }
  0x11   : > { %p1639_p12 = pnand %p1646_p9, %p1638_p11 }
  0x13   : > { %1641 = dma.hbm_to_vmem [thread:$0]  (!%p1639_p12), %s205_s11, 2304, %s207_s13, [#allocation3], %s1805_s14, %s1805_s14, %s1806_s15  }
  0x15   : > { %1781 = dma.done.wait (%p1646_p9), [#allocation3], 2304  }
  0x16   : > { %1783 = vsyncadd (%p1646_p9), [#allocation3], 4294964992  ;;  %s1904_s16 = sshll.u32 %s1866_s25, 2  ;;  %v286_v0 = vlaneseq  ;;  %v1807_v10 = vmov 1.0   ;;  %v360_v12 = vld [vmem:[%s2304_s2] sm:$0xff]  ;;  %vm364_vm13 = vcmask 195584  }
  0x17   : > { %p276_p13 = scmp.lt.s32.totalorder %s1904_s16, 7  ;;  %vm510_vm14 = vcmask 1043456   ;;  %v1808_v16 = vmov 0.0   ;;  %v361_v21 = vld [vmem:[%s2304_s2 + $0x8] sm:$0xff]  ;;  %v362_v22 = vld [vmem:[%s2304_s2 + $0x10] sm:$0xff]  ;;  %v363_v23 = vld [vmem:[%s2304_s2 + $0x18] sm:$0xff] }
  0x18   : > { %v287_v1 = vshrl.u32 %v286_v0, 7  ;;  %v493_v24 = vld [vmem:[%s2305_s3] sm:$0xff]  ;;  %v494_v25 = vld [vmem:[%s2305_s3 + $0x8] sm:$0xff]  ;;  %v495_v26 = vld [vmem:[%s2305_s3 + $0x10] sm:$0xff]  ;;  %s272_s12 = sand.u32 1, %s1794_s22   ;;  %s1756_s9 = scalar_lea.hbm %s2308_s6, 8 }
  0x19   : > { %s277_s17 = scalar_select %p276_p13, %s1904_s16, 7  ;;  %v496_v27 = vld [vmem:[%s2305_s3 + $0x18] sm:$0xff]  ;;  %v639_v60 = vld [vmem:[#allocation2] sm:$0xff]  ;;  %v640_v61 = vld [vmem:[#allocation2 + $0x8] sm:$0xff] }
  0x1a   : > { %v289_v2 = vadd.s32 16, %v287_v1  ;;  %v288_v4 = vadd.s32 8, %v287_v1  ;;  %v641_v62 = vld [vmem:[#allocation2 + $0x10] sm:$0xff]  ;;  %v642_v63 = vld [vmem:[#allocation2 + $0x18] sm:$0xff]  ;;  %s2250_s13 = sshll.u32 %s272_s12, 2 }
  0x1b   : > { %s278_s20 = scalar_lea.vmem %s2302_s0, %s277_s17  ;;  %s283_s29 = scalar_lea.vmem %s2303_s1, %s277_s17 }
  0x1c   : > { %v290_v3 = vld [vmem:[%s278_s20] sm:$0xf]  ;;  %s1389_s17 = scalar_lea.hbm %s2308_s6, %s1904_s16  ;;  %s274_s18 = scalar_lea.vmem [#allocation5], %s2250_s13 }
  0x1d   : > { %v291_v5 = vperm.slane %v290_v3, 0  ;;  %v292_v6 = vperm.slane %v290_v3, 1  ;;  %v293_v7 = vperm.slane %v290_v3, 2  ;;  %v294_v8 = vperm.slane %v290_v3, 3  ;;  %v331_v9 = vld [vmem:[%s283_s29] sm:$0xf] }
  0x1e   : > { %v332_v11 = vperm.slane %v331_v9, 0  ;;  %v333_v13 = vperm.slane %v331_v9, 1  ;;  %v334_v14 = vperm.slane %v331_v9, 2  ;;  %v335_v15 = vperm.slane %v331_v9, 3  ;;  %v645_v3 = vld [vmem:[#allocation2 + $0x30] sm:$0xff]  ;;  %s1391_s16 = sshll.u32 %s274_s18, 4  ;;  %s1392_s16 = int_to_ptr.vmem [resolvable:$true] %s1391_s16 }
  0x1f   : > { %vm303_vm0 = vcmp.eq.s32.totalorder %v289_v2, %v291_v5  ;;  %vm304_vm1 = vcmp.eq.s32.totalorder %v289_v2, %v292_v6  ;;  %vm305_vm2 = vcmp.eq.s32.totalorder %v289_v2, %v293_v7  ;;  %vm306_vm3 = vcmp.eq.s32.totalorder %v289_v2, %v294_v8  ;;  %v644_v2 = vld [vmem:[#allocation2 + $0x28] sm:$0xff]  ;;  %s1393_s19 = sshll.u32 %s1389_s17, 4  ;;  %s1379_s20 = scalar_lea.sflag [#allocation4], %s272_s12  ;;  %s1394_s19 = int_to_ptr.hbm [resolvable:$true] %s1393_s19 }
  0x20   : > { %1500 = vmatpush.msk.msra.mxu0 %vm303_vm0, %v1807_v10  ;;  %1507 = vmatpush.msk.msra.mxu1 %vm304_vm1, %v1807_v10  ;;  %vm299_vm4 = vcmp.eq.s32.totalorder %v288_v4, %v291_v5  ;;  %vm300_vm5 = vcmp.eq.s32.totalorder %v288_v4, %v292_v6  ;;  %vm301_vm6 = vcmp.eq.s32.totalorder %v288_v4, %v293_v7  ;;  %s1750_s26 = sshra.s32 %s1394_s19, 4  ;;  %s1751_s26 = int_to_ptr.hbm [resolvable:$true] %s1750_s26 }
  0x21   : > { %1514 = vmatpush.msk.msra.mxu2 %vm305_vm2, %v1807_v10  ;;  %1521 = vmatpush.msk.msra.mxu3 %vm306_vm3, %v1807_v10  ;;  %vm302_vm7 = vcmp.eq.s32.totalorder %v288_v4, %v294_v8  ;;  %vm295_vm8 = vcmp.eq.s32.totalorder %v287_v1, %v291_v5  ;;  %vm296_vm9 = vcmp.eq.s32.totalorder %v287_v1, %v292_v6  ;;  %v647_v5 = vld [vmem:[#allocation2 + $0x40] sm:$0xff]  ;;  %s1752_s28 = scalar_lea.hbm %s1751_s26, 4  ;;  %p1757_p3 = scmp.lt.s32.totalorder %s1751_s26, %s2308_s6 }
  0x22   : > { %1501 = vmatpush.msk.msra.mxu0 %vm299_vm4, %v1807_v10  ;;  %1508 = vmatpush.msk.msra.mxu1 %vm300_vm5, %v1807_v10  ;;  %vm297_vm10 = vcmp.eq.s32.totalorder %v287_v1, %v293_v7  ;;  %vm298_vm11 = vcmp.eq.s32.totalorder %v287_v1, %v294_v8  ;;  %vm340_vm12 = vcmp.eq.s32.totalorder %v288_v4, %v332_v11  ;;  %p1753_p0 = scmp.ne.s32.totalorder %s1751_s26, %s1752_s28  ;;  %p1758_p4 = scmp.lt.s32.totalorder %s1756_s9, %s1752_s28 }
  0x23   : > { %1515 = vmatpush.msk.msra.mxu2 %vm301_vm6, %v1807_v10  ;;  %1522 = vmatpush.msk.msra.mxu3 %vm302_vm7, %v1807_v10  ;;  %v1496_v17 = vsel %vm340_vm12, 1.0, %v1808_v16  ;;  %vm341_vm15 = vcmp.eq.s32.totalorder %v288_v4, %v333_v13  ;;  %vm342_vm0 = vcmp.eq.s32.totalorder %v288_v4, %v334_v14  ;;  %vm343_vm1 = vcmp.eq.s32.totalorder %v288_v4, %v335_v15  ;;  %v646_v4 = vld [vmem:[#allocation2 + $0x38] sm:$0xff] }
  0x24   : > { %1502 = vmatpush.msk.msra.mxu0 %vm295_vm8, %v1807_v10  ;;  %1509 = vmatpush.msk.msra.mxu1 %vm296_vm9, %v1807_v10  ;;  %v1497_v18 = vsel %vm341_vm15, 1.0, %v1808_v16  ;;  %v1498_v19 = vsel %vm342_vm0, 1.0, %v1808_v16  ;;  %v1499_v20 = vsel %vm343_vm1, 1.0, %v1808_v16  ;;  %vm336_vm2 = vcmp.eq.s32.totalorder %v287_v1, %v332_v11  ;;  %p1754_p1 = pnand %p1753_p0, %p1883_p5  ;;  %p1759_p7 = por %p1758_p4, %p1757_p3 }
  0x25   : > { %1516 = vmatpush.msk.msra.mxu2 %vm297_vm10, %v1807_v10  ;;  %1523 = vmatpush.msk.msra.mxu3 %vm298_vm11, %v1807_v10  ;;  %vm337_vm3 = vcmp.eq.s32.totalorder %v287_v1, %v333_v13  ;;  %vm338_vm4 = vcmp.eq.s32.totalorder %v287_v1, %v334_v14  ;;  %vm339_vm5 = vcmp.eq.s32.totalorder %v287_v1, %v335_v15  ;;  %vm497_vm6 = vcmask 97280   ;;  %v643_v1 = vld [vmem:[#allocation2 + $0x20] sm:$0xff] }
  0x26   : > { %1503 = vmatmul.msk.f32.vlgmr.msra.gmra.mxu0 %vm364_vm13, %v360_v12  ;;  %1510 = vmatmul.msk.f32.vlgmr.msra.gmra.mxu1 %vm364_vm13, %v360_v12  ;;  %vm648_vm7 = vcmask 588800   ;;  %p1755_p2 = pneg %p1754_p1 }
  0x27   : > { %1517 = vmatmul.msk.f32.vlgmr.msra.gmra.mxu2 %vm364_vm13, %v360_v12  ;;  %1524 = vmatmul.msk.f32.vlgmr.msra.gmra.mxu3 %vm364_vm13, %v360_v12 }
  0x28   : > { %1528 = vmatpush.msk.msrb.mxu0 %vm510_vm14, %v1496_v17  ;;  %1534 = vmatpush.msk.msrb.mxu1 %vm510_vm14, %v1497_v18  ;;  %p1760_p8 = pnand %p1759_p7, %p1755_p2 }
  0x29   : > { %1540 = vmatpush.msk.msrb.mxu2 %vm510_vm14, %v1498_v19  ;;  %1546 = vmatpush.msk.msrb.mxu3 %vm510_vm14, %v1499_v20 }
  0x2a   : > { %1529 = vmatpush.msk.msrb.mxu0 %vm336_vm2, %v1807_v10  ;;  %1535 = vmatpush.msk.msrb.mxu1 %vm337_vm3, %v1807_v10 }
  0x2b   : > { %1541 = vmatpush.msk.msrb.mxu2 %vm338_vm4, %v1807_v10  ;;  %1547 = vmatpush.msk.msrb.mxu3 %vm339_vm5, %v1807_v10 }
  0x2c   : > { %683 = vmatpush.msra.mxu0 %v1807_v10  ;;  %727 = vmatpush.msra.mxu1 %v1807_v10 }
  0x2d   : > { %771 = vmatpush.msra.mxu2 %v1807_v10  ;;  %815 = vmatpush.msra.mxu3 %v1807_v10 }
  0x2e   : > { %1504 = vmatmul.msk.f32.gmra.mxu0 %vm364_vm13, %v361_v21  ;;  %1511 = vmatmul.msk.f32.gmra.mxu1 %vm364_vm13, %v361_v21 }
  0x2f   : > { %1518 = vmatmul.msk.f32.gmra.mxu2 %vm364_vm13, %v361_v21  ;;  %1525 = vmatmul.msk.f32.gmra.mxu3 %vm364_vm13, %v361_v21 }
  0x36   : > { %1505 = vmatmul.msk.f32.gmra.mxu0 %vm364_vm13, %v362_v22  ;;  %1512 = vmatmul.msk.f32.gmra.mxu1 %vm364_vm13, %v362_v22 }
  0x37   : > { %1519 = vmatmul.msk.f32.gmra.mxu2 %vm364_vm13, %v362_v22  ;;  %1526 = vmatmul.msk.f32.gmra.mxu3 %vm364_vm13, %v362_v22 }
  0x3e   : > { %1506 = vmatmul.msk.f32.gmra.mxu0 %vm364_vm13, %v363_v23  ;;  %1513 = vmatmul.msk.f32.gmra.mxu1 %vm364_vm13, %v363_v23 }
  0x3f   : > { %1520 = vmatmul.msk.f32.gmra.mxu2 %vm364_vm13, %v363_v23  ;;  %1527 = vmatmul.msk.f32.gmra.mxu3 %vm364_vm13, %v363_v23  ;;  %vm1366_vm13 = vcmask 1040384  }
  0x46   : > { %1530 = vmatmul.msk.f32.vlgmr.msrb.gmra.mxu0 %vm497_vm6, %v493_v24  ;;  %1536 = vmatmul.msk.f32.vlgmr.msrb.gmra.mxu1 %vm497_vm6, %v493_v24 }
  0x47   : > { %1542 = vmatmul.msk.f32.vlgmr.msrb.gmra.mxu2 %vm497_vm6, %v493_v24  ;;  %1548 = vmatmul.msk.f32.vlgmr.msrb.gmra.mxu3 %vm497_vm6, %v493_v24 }
  0x4e   : > { %1531 = vmatmul.msk.f32.gmra.mxu0 %vm497_vm6, %v494_v25  ;;  %1537 = vmatmul.msk.f32.gmra.mxu1 %vm497_vm6, %v494_v25 }
  0x4f   : > { %1543 = vmatmul.msk.f32.gmra.mxu2 %vm497_vm6, %v494_v25  ;;  %1549 = vmatmul.msk.f32.gmra.mxu3 %vm497_vm6, %v494_v25 }
  0x56   : > { %1532 = vmatmul.msk.f32.gmra.mxu0 %vm497_vm6, %v495_v26  ;;  %1538 = vmatmul.msk.f32.gmra.mxu1 %vm497_vm6, %v495_v26 }
  0x57   : > { %1544 = vmatmul.msk.f32.gmra.mxu2 %vm497_vm6, %v495_v26  ;;  %1550 = vmatmul.msk.f32.gmra.mxu3 %vm497_vm6, %v495_v26 }
  0x5e   : > { %1533 = vmatmul.msk.f32.gmra.mxu0 %vm497_vm6, %v496_v27  ;;  %1539 = vmatmul.msk.f32.gmra.mxu1 %vm497_vm6, %v496_v27 }
  0x5f   : > { %1545 = vmatmul.msk.f32.gmra.mxu2 %vm497_vm6, %v496_v27  ;;  %1551 = vmatmul.msk.f32.gmra.mxu3 %vm497_vm6, %v496_v27 }
  0xa3   : > { %v394_v28 = vpop.f32.mrf.mxu0  ;;  %v423_v29 = vpop.f32.mrf.mxu1 }
  0xaa   : > { %v1975_v30 = vpop.f32.mrf.mxu2  ;;  %v1977_v31 = vpop.f32.mrf.mxu3 }
  0xab   : > { %v397_v32 = vpop.f32.mrf.mxu0  ;;  %v426_v33 = vpop.f32.mrf.mxu1 }
  0xb2   : > { %v455_v34 = vpop.f32.mrf.mxu2  ;;  %v484_v35 = vpop.f32.mrf.mxu3 }
  0xb3   : > { %v400_v36 = vpop.f32.mrf.mxu0  ;;  %v429_v37 = vpop.f32.mrf.mxu1 }
  0xba   : > { %v458_v38 = vpop.f32.mrf.mxu2  ;;  %v487_v39 = vpop.f32.mrf.mxu3 }
  0xbb   : > { %v403_v40 = vpop.f32.mrf.mxu0  ;;  %v432_v41 = vpop.f32.mrf.mxu1 }
  0xc2   : > { %v461_v42 = vpop.f32.mrf.mxu2  ;;  %v490_v43 = vpop.f32.mrf.mxu3 }
  0xc3   : > { %v540_v44 = vpop.f32.mrf.mxu0  ;;  %v569_v45 = vpop.f32.mrf.mxu1 }
  0xca   : > { %v598_v46 = vpop.f32.mrf.mxu2  ;;  %v627_v47 = vpop.f32.mrf.mxu3 }
  0xcb   : > { %v543_v48 = vpop.f32.mrf.mxu0  ;;  %v572_v49 = vpop.f32.mrf.mxu1 }
  0xd2   : > { %v601_v50 = vpop.f32.mrf.mxu2  ;;  %v630_v51 = vpop.f32.mrf.mxu3 }
  0xd3   : > { %v546_v52 = vpop.f32.mrf.mxu0  ;;  %v575_v53 = vpop.f32.mrf.mxu1 }
  0xda   : > { %v604_v54 = vpop.f32.mrf.mxu2  ;;  %v633_v55 = vpop.f32.mrf.mxu3 }
  0xdb   : > { %v549_v56 = vpop.f32.mrf.mxu0  ;;  %v578_v57 = vpop.f32.mrf.mxu1 }
  0xdc   : > { %684 = vmatpush.msra.mxu0 %v549_v56  ;;  %728 = vmatpush.msra.mxu1 %v578_v57 }
  0xde   : > { %685 = vmatpush.msra.mxu0 %v546_v52  ;;  %729 = vmatpush.msra.mxu1 %v575_v53  ;;  %v1137_v52 = vld [vmem:[%s2307_s5] sm:$0xff] }
  0xe0   : > { %686 = vmatpush.msra.mxu0 %v543_v48  ;;  %730 = vmatpush.msra.mxu1 %v572_v49 }
  0xe2   : > { %v607_v58 = vpop.f32.mrf.mxu2  ;;  %v636_v59 = vpop.f32.mrf.mxu3  ;;  %687 = vmatpush.msra.mxu0 %v540_v44  ;;  %731 = vmatpush.msra.mxu1 %v569_v45 }
  0xe3   : > { %772 = vmatpush.msra.mxu2 %v607_v58  ;;  %816 = vmatpush.msra.mxu3 %v636_v59 }
  0xe4   : > { %688 = vmatpush.msra.mxu0 %v403_v40  ;;  %732 = vmatpush.msra.mxu1 %v432_v41 }
  0xe5   : > { %773 = vmatpush.msra.mxu2 %v604_v54  ;;  %817 = vmatpush.msra.mxu3 %v633_v55  ;;  %v1809_v55 = vmov 0  }
  0xe6   : > { %689 = vmatpush.msra.mxu0 %v400_v36  ;;  %733 = vmatpush.msra.mxu1 %v429_v37 }
  0xe7   : > { %774 = vmatpush.msra.mxu2 %v601_v50  ;;  %818 = vmatpush.msra.mxu3 %v630_v51 }
  0xe8   : > { %690 = vmatpush.msra.mxu0 %v397_v32  ;;  %734 = vmatpush.msra.mxu1 %v426_v33 }
  0xe9   : > { %775 = vmatpush.msra.mxu2 %v598_v46  ;;  %819 = vmatpush.msra.mxu3 %v627_v47 }
  0xea   : > { %691 = vmatpush.msra.mxu0 %v394_v28  ;;  %735 = vmatpush.msra.mxu1 %v423_v29 }
  0xeb   : > { %776 = vmatpush.msra.mxu2 %v461_v42  ;;  %820 = vmatpush.msra.mxu3 %v490_v43 }
  0xec   : > { %1552 = vmatmul.msk.f32.vlgmr.msra.gmra.mxu0 %vm648_vm7, %v639_v60  ;;  %1561 = vmatmul.msk.f32.vlgmr.msra.gmra.mxu1 %vm648_vm7, %v639_v60 }
  0xed   : > { %777 = vmatpush.msra.mxu2 %v458_v38  ;;  %821 = vmatpush.msra.mxu3 %v487_v39 }
  0xee   : > { %1687 = vset.pattern.permute.xlu0 %v1809_v55  ;;  %1688 = vset.pattern.permute.xlu1 %v1809_v55 }
  0xef   : > { %778 = vmatpush.msra.mxu2 %v455_v34  ;;  %822 = vmatpush.msra.mxu3 %v484_v35 }
  0xf0   : > { %1148 = vperm.xlu0 %1687, %v1137_v52   ;;  %1689 = vset.pattern.permute.xlu2 %v1809_v55 }
  0xf1   : > { %779 = vmatpush.msra.mxu2 %v1975_v30  ;;  %823 = vmatpush.msra.mxu3 %v1977_v31 }
  0xf2   : > { %1570 = vmatmul.msk.f32.vlgmr.msra.gmra.mxu2 %vm648_vm7, %v639_v60  ;;  %1579 = vmatmul.msk.f32.vlgmr.msra.gmra.mxu3 %vm648_vm7, %v639_v60 }
  0xf4   : > { %1553 = vmatmul.msk.f32.gmra.mxu0 %vm648_vm7, %v640_v61  ;;  %1562 = vmatmul.msk.f32.gmra.mxu1 %vm648_vm7, %v640_v61 }
  0xfa   : > { %1571 = vmatmul.msk.f32.gmra.mxu2 %vm648_vm7, %v640_v61  ;;  %1580 = vmatmul.msk.f32.gmra.mxu3 %vm648_vm7, %v640_v61 }
  0xfc   : > { %1554 = vmatmul.msk.f32.gmra.mxu0 %vm648_vm7, %v641_v62  ;;  %1563 = vmatmul.msk.f32.gmra.mxu1 %vm648_vm7, %v641_v62 }
 0x102   : > { %1572 = vmatmul.msk.f32.gmra.mxu2 %vm648_vm7, %v641_v62  ;;  %1581 = vmatmul.msk.f32.gmra.mxu3 %vm648_vm7, %v641_v62 }
 0x104   : > { %1555 = vmatmul.msk.f32.gmra.mxu0 %vm648_vm7, %v642_v63  ;;  %1564 = vmatmul.msk.f32.gmra.mxu1 %vm648_vm7, %v642_v63 }
 0x10a   : > { %1573 = vmatmul.msk.f32.gmra.mxu2 %vm648_vm7, %v642_v63  ;;  %1582 = vmatmul.msk.f32.gmra.mxu3 %vm648_vm7, %v642_v63 }
 0x10c   : > { %1556 = vmatmul.msk.f32.gmra.mxu0 %vm648_vm7, %v643_v1  ;;  %1565 = vmatmul.msk.f32.gmra.mxu1 %vm648_vm7, %v643_v1 }
 0x112   : > { %1574 = vmatmul.msk.f32.gmra.mxu2 %vm648_vm7, %v643_v1  ;;  %1583 = vmatmul.msk.f32.gmra.mxu3 %vm648_vm7, %v643_v1 }
 0x114   : > { %1557 = vmatmul.msk.f32.gmra.mxu0 %vm648_vm7, %v644_v2  ;;  %1566 = vmatmul.msk.f32.gmra.mxu1 %vm648_vm7, %v644_v2 }
 0x11a   : > { %1575 = vmatmul.msk.f32.gmra.mxu2 %vm648_vm7, %v644_v2  ;;  %1584 = vmatmul.msk.f32.gmra.mxu3 %vm648_vm7, %v644_v2 }
 0x11c   : > { %1558 = vmatmul.msk.f32.gmra.mxu0 %vm648_vm7, %v645_v3  ;;  %1567 = vmatmul.msk.f32.gmra.mxu1 %vm648_vm7, %v645_v3 }
 0x122   : > { %1576 = vmatmul.msk.f32.gmra.mxu2 %vm648_vm7, %v645_v3  ;;  %1585 = vmatmul.msk.f32.gmra.mxu3 %vm648_vm7, %v645_v3 }
 0x124   : > { %1559 = vmatmul.msk.f32.gmra.mxu0 %vm648_vm7, %v646_v4  ;;  %1568 = vmatmul.msk.f32.gmra.mxu1 %vm648_vm7, %v646_v4 }
 0x12a   : > { %1577 = vmatmul.msk.f32.gmra.mxu2 %vm648_vm7, %v646_v4  ;;  %1586 = vmatmul.msk.f32.gmra.mxu3 %vm648_vm7, %v646_v4 }
 0x12c   : > { %1560 = vmatmul.msk.f32.gmra.mxu0 %vm648_vm7, %v647_v5  ;;  %1569 = vmatmul.msk.f32.gmra.mxu1 %vm648_vm7, %v647_v5 }
 0x132   : > { %1578 = vmatmul.msk.f32.gmra.mxu2 %vm648_vm7, %v647_v5  ;;  %1587 = vmatmul.msk.f32.gmra.mxu3 %vm648_vm7, %v647_v5  ;;  %v889_v5 = vld [vmem:[#allocation2 + $0x48] sm:$0xff] }
 0x169   : > { %v2017_v6 = vpop.f32.mrf.mxu0  ;;  %v2019_v7 = vpop.f32.mrf.mxu1 }
 0x16a   : > { %v852_v1 = vmax.f32 %v2017_v6, 0.0  ;;  %v853_v2 = vmax.f32 %v2019_v7, 0.0  ;;  %v1139_v6 = vld [vmem:[%s2307_s5 + $0x10] sm:$0xff]  ;;  %v1138_v7 = vld [vmem:[%s2307_s5 + $0x8] sm:$0xff] }
 0x16b   : > { %1158 = vperm.xlu1 %1688, %v1139_v6   ;;  %1153 = vperm.xlu0 %1687, %v1138_v7  }
 0x171   : > { %v2021_v8 = vpop.f32.mrf.mxu0  ;;  %v2023_v9 = vpop.f32.mrf.mxu1 }
 0x172   : > { %v856_v60 = vmax.f32 %v2021_v8, 0.0  ;;  %v857_v61 = vmax.f32 %v2023_v9, 0.0 }
 0x175   : > { %v2025_v10 = vpop.f32.mrf.mxu2  ;;  %v2027_v11 = vpop.f32.mrf.mxu3 }
 0x179   : > { %v2029_v12 = vpop.f32.mrf.mxu0  ;;  %v2031_v13 = vpop.f32.mrf.mxu1 }
 0x17a   : > { %v860_v56 = vmax.f32 %v2029_v12, 0.0  ;;  %v861_v57 = vmax.f32 %v2031_v13, 0.0 }
 0x17d   : > { %v2033_v14 = vpop.f32.mrf.mxu2  ;;  %v2035_v15 = vpop.f32.mrf.mxu3 }
 0x181   : > { %v702_v16 = vpop.f32.mrf.mxu0  ;;  %v746_v17 = vpop.f32.mrf.mxu1 }
 0x182   : > { %v864_v50 = vmax.f32 %v702_v16, 0.0  ;;  %v865_v51 = vmax.f32 %v746_v17, 0.0 }
 0x185   : > { %v2037_v18 = vpop.f32.mrf.mxu2  ;;  %v2039_v19 = vpop.f32.mrf.mxu3 }
 0x189   : > { %v705_v20 = vpop.f32.mrf.mxu0  ;;  %v749_v21 = vpop.f32.mrf.mxu1 }
 0x18a   : > { %v868_v48 = vmax.f32 %v705_v20, 0.0  ;;  %v869_v49 = vmax.f32 %v749_v21, 0.0  ;;  %v862_v20 = vmax.f32 %v2037_v18, 0.0  ;;  %v863_v21 = vmax.f32 %v2039_v19, 0.0 }
 0x18b   : > { %v854_v18 = vmax.f32 %v2025_v10, 0.0  ;;  %v855_v19 = vmax.f32 %v2027_v11, 0.0  ;;  %v892_v10 = vld [vmem:[#allocation2 + $0x60] sm:$0xff]  ;;  %v1143_v11 = vld [vmem:[%s2307_s5 + $0x30] sm:$0xff] }
 0x18c   : > { %1178 = vperm.xlu0 %1687, %v1143_v11  }
 0x18d   : > { %v2041_v22 = vpop.f32.mrf.mxu2  ;;  %v2043_v23 = vpop.f32.mrf.mxu3 }
 0x18e   : > { %v866_v16 = vmax.f32 %v2041_v22, 0.0  ;;  %v867_v17 = vmax.f32 %v2043_v23, 0.0  ;;  %v1140_v22 = vld [vmem:[%s2307_s5 + $0x18] sm:$0xff] }
 0x18f   : > { %1163 = vperm.xlu1 %1688, %v1140_v22   ;;  %v1144_v23 = vld [vmem:[%s2307_s5 + $0x38] sm:$0xff] }
 0x191   : > { %v708_v24 = vpop.f32.mrf.mxu0  ;;  %v752_v25 = vpop.f32.mrf.mxu1 }
 0x192   : > { %v872_v46 = vmax.f32 %v708_v24, 0.0  ;;  %v873_v47 = vmax.f32 %v752_v25, 0.0  ;;  %v890_v24 = vld [vmem:[#allocation2 + $0x50] sm:$0xff]  ;;  %v858_v25 = vmax.f32 %v2033_v14, 0.0  ;;  %v891_v14 = vld [vmem:[#allocation2 + $0x58] sm:$0xff] }
 0x195   : > { %v2045_v26 = vpop.f32.mrf.mxu2  ;;  %v2047_v27 = vpop.f32.mrf.mxu3 }
 0x196   : > { %v870_v12 = vmax.f32 %v2045_v26, 0.0  ;;  %v871_v13 = vmax.f32 %v2047_v27, 0.0  ;;  %v859_v26 = vmax.f32 %v2035_v15, 0.0  ;;  %v893_v15 = vld [vmem:[#allocation2 + $0x68] sm:$0xff]  ;;  %v1141_v27 = vld [vmem:[%s2307_s5 + $0x20] sm:$0xff] }
 0x197   : > { %1183 = vperm.xlu1 %1688, %v1144_v23   ;;  %1168 = vperm.xlu2 %1689, %v1141_v27  }
 0x199   : > { %v711_v28 = vpop.f32.mrf.mxu0  ;;  %v755_v29 = vpop.f32.mrf.mxu1 }
 0x19a   : > { %v876_v42 = vmax.f32 %v711_v28, 0.0  ;;  %v877_v45 = vmax.f32 %v755_v29, 0.0  ;;  %v894_v28 = vld [vmem:[#allocation2 + $0x70] sm:$0xff]  ;;  %v1142_v29 = vld [vmem:[%s2307_s5 + $0x28] sm:$0xff] }
 0x19d   : > { %v2049_v30 = vpop.f32.mrf.mxu2  ;;  %v2051_v31 = vpop.f32.mrf.mxu3 }
 0x19e   : > { %v874_v8 = vmax.f32 %v2049_v30, 0.0  ;;  %v875_v9 = vmax.f32 %v2051_v31, 0.0  ;;  %v895_v30 = vld [vmem:[#allocation2 + $0x78] sm:$0xff]  ;;  %v1145_v31 = vld [vmem:[%s2307_s5 + $0x40] sm:$0xff] }
 0x19f   : > { %1173 = vperm.xlu2 %1689, %v1142_v29  }
 0x1a1   : > { %v714_v32 = vpop.f32.mrf.mxu0  ;;  %v758_v33 = vpop.f32.mrf.mxu1 }
 0x1a2   : > { %v880_v38 = vmax.f32 %v714_v32, 0.0  ;;  %v881_v39 = vmax.f32 %v758_v33, 0.0  ;;  %v896_v32 = vld [vmem:[#allocation2 + $0x80] sm:$0xff]  ;;  %v897_v33 = vld [vmem:[#allocation2 + $0x88] sm:$0xff] }
 0x1a5   : > { %v2053_v34 = vpop.f32.mrf.mxu2  ;;  %v2055_v35 = vpop.f32.mrf.mxu3 }
 0x1a6   : > { %v878_v3 = vmax.f32 %v2053_v34, 0.0  ;;  %v879_v4 = vmax.f32 %v2055_v35, 0.0 }
 0x1a7   : > { %1188 = vperm.xlu2 %1689, %v1145_v31  }
 0x1a9   : > { %v717_v36 = vpop.f32.mrf.mxu0  ;;  %v761_v37 = vpop.f32.mrf.mxu1 }
 0x1aa   : > { %v884_v40 = vmax.f32 %v717_v36, 0.0  ;;  %v885_v41 = vmax.f32 %v761_v37, 0.0 }
 0x1ac   : > { %932 = vmatpush.msrb.mxu0 %v884_v40  ;;  %976 = vmatpush.msrb.mxu1 %v885_v41 }
 0x1ad   : > { %v802_v43 = vpop.f32.mrf.mxu2  ;;  %v846_v44 = vpop.f32.mrf.mxu3 }
 0x1ae   : > { %933 = vmatpush.msrb.mxu0 %v880_v38  ;;  %977 = vmatpush.msrb.mxu1 %v881_v39  ;;  %v882_v62 = vmax.f32 %v802_v43, 0.0  ;;  %v883_v63 = vmax.f32 %v846_v44, 0.0 }
 0x1b0   : > { %934 = vmatpush.msrb.mxu0 %v876_v42  ;;  %978 = vmatpush.msrb.mxu1 %v877_v45 }
 0x1b2   : > { %935 = vmatpush.msrb.mxu0 %v872_v46  ;;  %979 = vmatpush.msrb.mxu1 %v873_v47 }
 0x1b4   : > { %936 = vmatpush.msrb.mxu0 %v868_v48  ;;  %980 = vmatpush.msrb.mxu1 %v869_v49 }
 0x1b5   : > { %v805_v53 = vpop.f32.mrf.mxu2  ;;  %v849_v54 = vpop.f32.mrf.mxu3 }
 0x1b6   : > { %v886_v58 = vmax.f32 %v805_v53, 0.0  ;;  %v887_v59 = vmax.f32 %v849_v54, 0.0  ;;  %937 = vmatpush.msrb.mxu0 %v864_v50  ;;  %981 = vmatpush.msrb.mxu1 %v865_v51  ;;  %v2152_v50 = vpop.permute.xlu0 %1148 }
 0x1b8   : > { %938 = vmatpush.msrb.mxu0 %v860_v56  ;;  %982 = vmatpush.msrb.mxu1 %v861_v57 }
 0x1b9   : > { %1020 = vmatpush.msrb.mxu2 %v886_v58  ;;  %1064 = vmatpush.msrb.mxu3 %v887_v59 }
 0x1ba   : > { %939 = vmatpush.msrb.mxu0 %v856_v60  ;;  %983 = vmatpush.msrb.mxu1 %v857_v61 }
 0x1bb   : > { %1021 = vmatpush.msrb.mxu2 %v882_v62  ;;  %1065 = vmatpush.msrb.mxu3 %v883_v63 }
 0x1bc   : > { %940 = vmatpush.msrb.mxu0 %v852_v1  ;;  %984 = vmatpush.msrb.mxu1 %v853_v2 }
 0x1bd   : > { %1022 = vmatpush.msrb.mxu2 %v878_v3  ;;  %1066 = vmatpush.msrb.mxu3 %v879_v4 }
 0x1be   : > { %1597 = vmatmul.msk.f32.vlgmr.msrb.gmra.mxu1 %vm648_vm7, %v889_v5  ;;  %1588 = vmatmul.msk.f32.vlgmr.msrb.gmra.mxu0 %vm648_vm7, %v889_v5 }
 0x1bf   : > { %1023 = vmatpush.msrb.mxu2 %v874_v8  ;;  %1067 = vmatpush.msrb.mxu3 %v875_v9 }
 0x1c1   : > { %1024 = vmatpush.msrb.mxu2 %v870_v12  ;;  %1068 = vmatpush.msrb.mxu3 %v871_v13 }
 0x1c3   : > { %1025 = vmatpush.msrb.mxu2 %v866_v16  ;;  %1069 = vmatpush.msrb.mxu3 %v867_v17 }
 0x1c5   : > { %1026 = vmatpush.msrb.mxu2 %v862_v20  ;;  %1070 = vmatpush.msrb.mxu3 %v863_v21 }
 0x1c6   : > { %1598 = vmatmul.msk.f32.gmra.mxu1 %vm648_vm7, %v890_v24  ;;  %1589 = vmatmul.msk.f32.gmra.mxu0 %vm648_vm7, %v890_v24 }
 0x1c7   : > { %1027 = vmatpush.msrb.mxu2 %v858_v25  ;;  %1071 = vmatpush.msrb.mxu3 %v859_v26 }
 0x1c9   : > { %1028 = vmatpush.msrb.mxu2 %v854_v18  ;;  %1072 = vmatpush.msrb.mxu3 %v855_v19 }
 0x1ca   : > { %1606 = vmatmul.msk.f32.vlgmr.msrb.gmra.mxu2 %vm648_vm7, %v889_v5  ;;  %1615 = vmatmul.msk.f32.vlgmr.msrb.gmra.mxu3 %vm648_vm7, %v889_v5 }
 0x1ce   : > { %1599 = vmatmul.msk.f32.gmra.mxu1 %vm648_vm7, %v891_v14  ;;  %1590 = vmatmul.msk.f32.gmra.mxu0 %vm648_vm7, %v891_v14 }
 0x1d2   : > { %1607 = vmatmul.msk.f32.gmra.mxu2 %vm648_vm7, %v890_v24  ;;  %1616 = vmatmul.msk.f32.gmra.mxu3 %vm648_vm7, %v890_v24 }
 0x1d6   : > { %1600 = vmatmul.msk.f32.gmra.mxu1 %vm648_vm7, %v892_v10  ;;  %1591 = vmatmul.msk.f32.gmra.mxu0 %vm648_vm7, %v892_v10 }
 0x1da   : > { %1608 = vmatmul.msk.f32.gmra.mxu2 %vm648_vm7, %v891_v14  ;;  %1617 = vmatmul.msk.f32.gmra.mxu3 %vm648_vm7, %v891_v14 }
 0x1dd   : > { %v2154_v53 = vpop.permute.xlu1 %1158  ;;  %v2162_v61 = vpop.permute.xlu0 %1153 }
 0x1de   : > { %1601 = vmatmul.msk.f32.gmra.mxu1 %vm648_vm7, %v893_v15  ;;  %1592 = vmatmul.msk.f32.gmra.mxu0 %vm648_vm7, %v893_v15 }
 0x1e2   : > { %1609 = vmatmul.msk.f32.gmra.mxu2 %vm648_vm7, %v892_v10  ;;  %1618 = vmatmul.msk.f32.gmra.mxu3 %vm648_vm7, %v892_v10 }
 0x1e6   : > { %1602 = vmatmul.msk.f32.gmra.mxu1 %vm648_vm7, %v894_v28  ;;  %1593 = vmatmul.msk.f32.gmra.mxu0 %vm648_vm7, %v894_v28 }
 0x1ea   : > { %1610 = vmatmul.msk.f32.gmra.mxu2 %vm648_vm7, %v893_v15  ;;  %1619 = vmatmul.msk.f32.gmra.mxu3 %vm648_vm7, %v893_v15 }
 0x1ee   : > { %1603 = vmatmul.msk.f32.gmra.mxu1 %vm648_vm7, %v895_v30  ;;  %1594 = vmatmul.msk.f32.gmra.mxu0 %vm648_vm7, %v895_v30 }
 0x1f1   : > { %v2160_v60 = vpop.permute.xlu2 %1168 }
 0x1f2   : > { %1611 = vmatmul.msk.f32.gmra.mxu2 %vm648_vm7, %v894_v28  ;;  %1620 = vmatmul.msk.f32.gmra.mxu3 %vm648_vm7, %v894_v28 }
 0x1f6   : > { %1604 = vmatmul.msk.f32.gmra.mxu1 %vm648_vm7, %v896_v32  ;;  %1595 = vmatmul.msk.f32.gmra.mxu0 %vm648_vm7, %v896_v32 }
 0x1f9   : > { %v2178_v10 = vpop.permute.xlu2 %1173 }
 0x1fa   : > { %1612 = vmatmul.msk.f32.gmra.mxu2 %vm648_vm7, %v895_v30  ;;  %1621 = vmatmul.msk.f32.gmra.mxu3 %vm648_vm7, %v895_v30 }
 0x1fe   : > { %1605 = vmatmul.msk.f32.gmra.mxu1 %vm648_vm7, %v897_v33  ;;  %1596 = vmatmul.msk.f32.gmra.mxu0 %vm648_vm7, %v897_v33  ;;  %v2182_v31 = vpop.permute.xlu0 %1178 }
 0x201   : > { %v2173_v17 = vpop.permute.xlu1 %1163 }
 0x202   : > { %1613 = vmatmul.msk.f32.gmra.mxu2 %vm648_vm7, %v896_v32  ;;  %1622 = vmatmul.msk.f32.gmra.mxu3 %vm648_vm7, %v896_v32 }
 0x20a   : > { %1614 = vmatmul.msk.f32.gmra.mxu2 %vm648_vm7, %v897_v33  ;;  %1623 = vmatmul.msk.f32.gmra.mxu3 %vm648_vm7, %v897_v33 }
 0x23b   : > { %v986_v34 = vpop.f32.mrf.mxu1  ;;  %v942_v35 = vpop.f32.mrf.mxu0 }
 0x23c   : > { %v1101_v54 = vmax.f32 %v942_v35, 0.0  ;;  %v1102_v58 = vmax.f32 %v986_v34, 0.0 }
 0x23e   : > { %v1191_v63 = vmul.f32 %v2152_v50, %v1101_v54  ;;  %v1192_v3 = vmul.f32 %v2152_v50, %v1102_v58 }
 0x243   : > { %v989_v36 = vpop.f32.mrf.mxu1  ;;  %v945_v37 = vpop.f32.mrf.mxu0 }
 0x244   : > { %v1105_v55 = vmax.f32 %v945_v37, 0.0  ;;  %v1106_v59 = vmax.f32 %v989_v36, 0.0 }
 0x246   : > { %v1195_v1 = vmul.f32 %v2162_v61, %v1105_v55  ;;  %v1196_v8 = vmul.f32 %v2162_v61, %v1106_v59 }
 0x248   : > { %v1227_v16 = vadd.f32 %v1195_v1, %v1191_v63  ;;  %v1241_v21 = vadd.f32 %v1196_v8, %v1192_v3 }
 0x24b   : > { %v992_v38 = vpop.f32.mrf.mxu1  ;;  %v948_v39 = vpop.f32.mrf.mxu0 }
 0x24c   : > { %v1109_v62 = vmax.f32 %v948_v39, 0.0  ;;  %v1110_v2 = vmax.f32 %v992_v38, 0.0 }
 0x24d   : > { %v2140_v40 = vpop.f32.mrf.mxu2  ;;  %v2142_v41 = vpop.f32.mrf.mxu3 }
 0x24e   : > { %v1199_v13 = vmul.f32 %v2154_v53, %v1109_v62  ;;  %v1200_v20 = vmul.f32 %v2154_v53, %v1110_v2  ;;  %v2197_v62 = vpop.permute.xlu2 %1188  ;;  %v1103_v63 = vmax.f32 %v2140_v40, 0.0 }
 0x250   : > { %v1228_v18 = vadd.f32 %v1227_v16, %v1199_v13  ;;  %v1242_v11 = vadd.f32 %v1241_v21, %v1200_v20 }
 0x253   : > { %v995_v42 = vpop.f32.mrf.mxu1  ;;  %v951_v43 = vpop.f32.mrf.mxu0 }
 0x254   : > { %v1114_v9 = vmax.f32 %v995_v42, 0.0  ;;  %v1113_v6 = vmax.f32 %v951_v43, 0.0  ;;  %v2190_v42 = vpop.permute.xlu1 %1183 }
 0x255   : > { %v2144_v44 = vpop.f32.mrf.mxu2  ;;  %v2146_v45 = vpop.f32.mrf.mxu3 }
 0x256   : > { %v1203_v26 = vmul.f32 %v2173_v17, %v1113_v6  ;;  %v1204_v22 = vmul.f32 %v2173_v17, %v1114_v9  ;;  %v1108_v1 = vmax.f32 %v2146_v45, 0.0 }
 0x258   : > { %v1229_v34 = vadd.f32 %v1228_v18, %v1203_v26  ;;  %v1243_v35 = vadd.f32 %v1242_v11, %v1204_v22 }
 0x25b   : > { %v998_v46 = vpop.f32.mrf.mxu1  ;;  %v954_v47 = vpop.f32.mrf.mxu0 }
 0x25c   : > { %v1118_v24 = vmax.f32 %v998_v46, 0.0  ;;  %v1117_v25 = vmax.f32 %v954_v47, 0.0 }
 0x25d   : > { %v2148_v48 = vpop.f32.mrf.mxu2  ;;  %v2150_v49 = vpop.f32.mrf.mxu3 }
 0x25e   : > { %v1207_v28 = vmul.f32 %v2160_v60, %v1117_v25  ;;  %v1208_v29 = vmul.f32 %v2160_v60, %v1118_v24  ;;  %v1111_v6 = vmax.f32 %v2148_v48, 0.0  ;;  %v1112_v13 = vmax.f32 %v2150_v49, 0.0 }
 0x25f   : > { %v1193_v48 = vmul.f32 %v2152_v50, %v1103_v63 }
 0x260   : > { %v1230_v47 = vadd.f32 %v1229_v34, %v1207_v28  ;;  %v1201_v11 = vmul.f32 %v2154_v53, %v1111_v6 }
 0x263   : > { %v1001_v51 = vpop.f32.mrf.mxu1  ;;  %v957_v52 = vpop.f32.mrf.mxu0 }
 0x264   : > { %v1122_v19 = vmax.f32 %v1001_v51, 0.0  ;;  %v1121_v14 = vmax.f32 %v957_v52, 0.0  ;;  %v1244_v51 = vadd.f32 %v1243_v35, %v1208_v29  ;;  %v1107_v52 = vmax.f32 %v2144_v44, 0.0 }
 0x265   : > { %v2156_v56 = vpop.f32.mrf.mxu2  ;;  %v2158_v57 = vpop.f32.mrf.mxu3  ;;  %v1104_v44 = vmax.f32 %v2142_v41, 0.0  ;;  %v1198_v41 = vmul.f32 %v2162_v61, %v1108_v1 }
 0x266   : > { %v1211_v37 = vmul.f32 %v2178_v10, %v1121_v14  ;;  %v1212_v38 = vmul.f32 %v2178_v10, %v1122_v19  ;;  %v1197_v16 = vmul.f32 %v2162_v61, %v1107_v52  ;;  %v1115_v26 = vmax.f32 %v2156_v56, 0.0 }
 0x267   : > { %v1116_v22 = vmax.f32 %v2158_v57, 0.0  ;;  %v1194_v19 = vmul.f32 %v2152_v50, %v1104_v44 }
 0x268   : > { %v1231_v54 = vadd.f32 %v1230_v47, %v1211_v37  ;;  %v1245_v55 = vadd.f32 %v1244_v51, %v1212_v38  ;;  %v1205_v29 = vmul.f32 %v2173_v17, %v1115_v26 }
 0x269   : > { %v1269_v57 = vadd.f32 %v1198_v41, %v1194_v19 }
 0x26b   : > { %v1004_v4 = vpop.f32.mrf.mxu1  ;;  %v960_v5 = vpop.f32.mrf.mxu0 }
 0x26c   : > { %v1126_v27 = vmax.f32 %v1004_v4, 0.0  ;;  %v1125_v30 = vmax.f32 %v960_v5, 0.0 }
 0x26d   : > { %v2168_v7 = vpop.f32.mrf.mxu2  ;;  %v2170_v12 = vpop.f32.mrf.mxu3 }
 0x26e   : > { %v1215_v43 = vmul.f32 %v2182_v31, %v1125_v30  ;;  %v1216_v46 = vmul.f32 %v2182_v31, %v1126_v27  ;;  %v1119_v14 = vmax.f32 %v2168_v7, 0.0  ;;  %v1255_v27 = vadd.f32 %v1197_v16, %v1193_v48 }
 0x26f   : > { %v1206_v30 = vmul.f32 %v2173_v17, %v1116_v22 }
 0x270   : > { %v1232_v4 = vadd.f32 %v1231_v54, %v1215_v43  ;;  %v1246_v5 = vadd.f32 %v1245_v55, %v1216_v46  ;;  %v1209_v35 = vmul.f32 %v2160_v60, %v1119_v14 }
 0x273   : > { %v1007_v15 = vpop.f32.mrf.mxu1  ;;  %v963_v23 = vpop.f32.mrf.mxu0 }
 0x274   : > { %v1130_v36 = vmax.f32 %v1007_v15, 0.0  ;;  %v1129_v39 = vmax.f32 %v963_v23, 0.0  ;;  %v1202_v15 = vmul.f32 %v2154_v53, %v1112_v13  ;;  %v1120_v23 = vmax.f32 %v2170_v12, 0.0 }
 0x275   : > { %v2184_v32 = vpop.f32.mrf.mxu2  ;;  %v2186_v33 = vpop.f32.mrf.mxu3 }
 0x276   : > { %v1219_v58 = vmul.f32 %v2190_v42, %v1129_v39  ;;  %v1220_v59 = vmul.f32 %v2190_v42, %v1130_v36  ;;  %v1123_v61 = vmax.f32 %v2184_v32, 0.0  ;;  %v1124_v50 = vmax.f32 %v2186_v33, 0.0 }
 0x277   : > { %v1256_v36 = vadd.f32 %v1255_v27, %v1201_v11  ;;  %v1270_v53 = vadd.f32 %v1269_v57, %v1202_v15  ;;  %v1210_v39 = vmul.f32 %v2160_v60, %v1120_v23 }
 0x278   : > { %v1233_v24 = vadd.f32 %v1232_v4, %v1219_v58  ;;  %v1247_v40 = vadd.f32 %v1246_v5, %v1220_v59  ;;  %v1213_v17 = vmul.f32 %v2178_v10, %v1123_v61  ;;  %v1214_v33 = vmul.f32 %v2178_v10, %v1124_v50 }
 0x279   : > { %v1257_v47 = vadd.f32 %v1256_v36, %v1205_v29  ;;  %v1271_v51 = vadd.f32 %v1270_v53, %v1206_v30 }
 0x27b   : > { %v1010_v2 = vpop.f32.mrf.mxu1  ;;  %v966_v3 = vpop.f32.mrf.mxu0  ;;  %v1258_v63 = vadd.f32 %v1257_v47, %v1209_v35 }
 0x27c   : > { %v1134_v8 = vmax.f32 %v1010_v2, 0.0  ;;  %v1133_v9 = vmax.f32 %v966_v3, 0.0  ;;  %v1272_v2 = vadd.f32 %v1271_v51, %v1210_v39 }
 0x27d   : > { %v1048_v20 = vpop.f32.mrf.mxu2  ;;  %v1092_v21 = vpop.f32.mrf.mxu3  ;;  %v1259_v4 = vadd.f32 %v1258_v63, %v1213_v17 }
 0x27e   : > { %v1224_v45 = vmul.f32 %v2197_v62, %v1134_v8  ;;  %v1223_v25 = vmul.f32 %v2197_v62, %v1133_v9  ;;  %v1127_v37 = vmax.f32 %v1048_v20, 0.0  ;;  %v1128_v43 = vmax.f32 %v1092_v21, 0.0 }
 0x27f   : > { %v1273_v8 = vadd.f32 %v1272_v2, %v1214_v33 }
 0x280   : > { %v1248_v18 = vadd.f32 %v1247_v40, %v1224_v45  ;;  %v1234_v49 = vadd.f32 %v1233_v24, %v1223_v25  ;;  %v1217_v59 = vmul.f32 %v2182_v31, %v1127_v37  ;;  %v1218_v1 = vmul.f32 %v2182_v31, %v1128_v43 }
 0x282   : > { %v1249_v56 = vrot.slane %v1248_v18, 4  ;;  %v1235_v28 = vrot.slane %v1234_v49, 4  ;;  %v1260_v10 = vadd.f32 %v1259_v4, %v1217_v59  ;;  %v1274_v20 = vadd.f32 %v1273_v8, %v1218_v1 }
 0x284   : > { %v1250_v34 = vadd.f32 %v1249_v56, %v1248_v18  ;;  %v1236_v7 = vadd.f32 %v1235_v28, %v1234_v49 }
 0x285   : > { %v1051_v12 = vpop.f32.mrf.mxu2  ;;  %v1095_v38 = vpop.f32.mrf.mxu3 }
 0x286   : > { %v1251_v46 = vrot.slane %v1250_v34, 2  ;;  %v1237_v32 = vrot.slane %v1236_v7, 2  ;;  %v1131_v52 = vmax.f32 %v1051_v12, 0.0  ;;  %v1132_v58 = vmax.f32 %v1095_v38, 0.0 }
 0x288   : > { %v1252_v54 = vadd.f32 %v1251_v46, %v1250_v34  ;;  %v1238_v55 = vadd.f32 %v1237_v32, %v1236_v7  ;;  %v1221_v5 = vmul.f32 %v2190_v42, %v1131_v52  ;;  %v1222_v6 = vmul.f32 %v2190_v42, %v1132_v58 }
 0x28a   : > { %v1253_v60 = vrot.slane %v1252_v54, 1  ;;  %v1239_v3 = vrot.slane %v1238_v55, 1  ;;  %v1261_v31 = vadd.f32 %v1260_v10, %v1221_v5  ;;  %v1275_v25 = vadd.f32 %v1274_v20, %v1222_v6 }
 0x28c   : > { %v1254_v9 = vadd.f32 %v1253_v60, %v1252_v54  ;;  %v1240_v44 = vadd.f32 %v1239_v3, %v1238_v55 }
 0x28d   : > { %v1054_v13 = vpop.f32.mrf.mxu2  ;;  %v1098_v16 = vpop.f32.mrf.mxu3 }
 0x28e   : > { %v1625_v21 = vmul.f32 -1.442695, %v1254_v9  ;;  %v1135_v24 = vmax.f32 %v1054_v13, 0.0  ;;  %v1136_v40 = vmax.f32 %v1098_v16, 0.0  ;;  %v1624_v45 = vmul.f32 -1.442695, %v1240_v44 }
 0x290   : > { %1690 = vpow2.f32 %v1625_v21  ;;  %v1225_v26 = vmul.f32 %v2197_v62, %v1135_v24  ;;  %v1226_v22 = vmul.f32 %v2197_v62, %v1136_v40 }
 0x291   : > { %1692 = vpow2.f32 %v1624_v45 }
 0x292   : > { %v1262_v41 = vadd.f32 %v1261_v31, %v1225_v26  ;;  %v1276_v48 = vadd.f32 %v1275_v25, %v1226_v22 }
 0x294   : > { %v1263_v18 = vrot.slane %v1262_v41, 4  ;;  %v1277_v42 = vrot.slane %v1276_v48, 4 }
 0x296   : > { %v1691_v49 = vpop.eup %1690  ;;  %v1264_v19 = vadd.f32 %v1263_v18, %v1262_v41  ;;  %v1278_v14 = vadd.f32 %v1277_v42, %v1276_v48 }
 0x297   : > { %v1296_v11 = vadd.f32 1.0, %v1691_v49  ;;  %v1693_v27 = vpop.eup %1692 }
 0x298   : > { %v1265_v15 = vrot.slane %v1264_v19, 2  ;;  %v1279_v23 = vrot.slane %v1278_v14, 2  ;;  %v2230_v57 = vadd.f32 1.0, %v1693_v27 }
 0x299   : > { %1694 = vrcp.f32 %v1296_v11  ;;  %v1325_v47 = vand.u32 2147483648, %v1296_v11  ;;  %vm1319_vm9 = vweird.f32 %v1296_v11  ;;  %v1323_v58 = vand.u32 2147483647, %v1296_v11 }
 0x29a   : > { %v1266_v56 = vadd.f32 %v1265_v15, %v1264_v19  ;;  %v1280_v28 = vadd.f32 %v1279_v23, %v1278_v14  ;;  %1696 = vrcp.f32 %v2230_v57  ;;  %vm1304_vm10 = vweird.f32 %v2230_v57 }
 0x29b   : > { %v1326_v1 = vor.u32 1.1754944e-38, %v1325_v47  ;;  %vm1324_vm15 = vcmp.eq.f32.partialorder %v1323_v58, 8.507059e+37  ;;  %v1310_v13 = vand.u32 2147483648, %v2230_v57  ;;  %v1308_v21 = vand.u32 2147483647, %v2230_v57 }
 0x29c   : > { %v1267_v61 = vrot.slane %v1266_v56, 1  ;;  %v1281_v29 = vrot.slane %v1280_v28, 1 }
 0x29d   : > { %v1311_v48 = vor.u32 1.1754944e-38, %v1310_v13 }
 0x29e   : > { %v1268_v62 = vadd.f32 %v1267_v61, %v1266_v56  ;;  %v1282_v30 = vadd.f32 %v1281_v29, %v1280_v28 }
 0x29f   : > { %v1695_v7 = vpop.eup %1694 }
 0x2a0   : > { %v1626_v50 = vmul.f32 -1.442695, %v1268_v62  ;;  %v1627_v34 = vmul.f32 -1.442695, %v1282_v30  ;;  %v1315_v35 = vmul.f32 %v1695_v7, %v1296_v11  ;;  %v2233_v36 = vpop.eup %1696  ;;  %vm1320_vm8 = vweird.f32 %v1695_v7 }
 0x2a1   : > { %v1300_v38 = vmul.f32 %v2233_v36, %v2230_v57  ;;  %vm1305_vm11 = vweird.f32 %v2233_v36  ;;  %vm2241_vm12 = vmor %vm1319_vm9, %vm1320_vm8  ;;  %vm1368_vm8 = vcmask 1042434   ;;  %vm1309_vm9 = vcmp.eq.f32.partialorder %v1308_v21, 8.507059e+37 }
 0x2a2   : > { %1698 = vpow2.f32 %v1626_v50  ;;  %v1316_v12 = vsub.f32 1.0, %v1315_v35  ;;  %vm2256_vm1 = vmor %vm1304_vm10, %vm1305_vm11  ;;  %vm1370_vm10 = vcmask 1041408   ;;  %vm1375_vm11 = vcmp.lt.s32.totalorder %v286_v0, 512 }
 0x2a3   : > { %1700 = vpow2.f32 %v1627_v34  ;;  %v1301_v46 = vsub.f32 1.0, %v1300_v38 }
 0x2a4   : > { %v1317_v32 = vmul.f32 %v1695_v7, %v1316_v12 }
 0x2a5   : > { %v1302_v17 = vmul.f32 %v2233_v36, %v1301_v46 }
 0x2a6   : > { %v1318_v52 = vadd.f32 %v1695_v7, %v1317_v32 }
 0x2a7   : > { %v1303_v60 = vadd.f32 %v2233_v36, %v1302_v17 }
 0x2a8   : > { %v1699_v53 = vpop.eup %1698  ;;  %v1322_v3 = vsel %vm2241_vm12, %v1695_v7, %v1318_v52 }
 0x2a9   : > { %v1701_v37 = vpop.eup %1700  ;;  %v1297_v39 = vadd.f32 1.0, %v1699_v53  ;;  %v1327_v16 = vsel %vm1324_vm15, %v1326_v1, %v1322_v3  ;;  %v1307_v45 = vsel %vm2256_vm1, %v2233_v36, %v1303_v60 }
 0x2aa   : > { %v1298_v43 = vadd.f32 1.0, %v1701_v37  ;;  %v1363_v41 = vrot.slane %v1327_v16, 7  ;;  %v1312_v19 = vsel %vm1309_vm9, %v1311_v48, %v1307_v45 }
 0x2ab   : > { %1702 = vrcp.f32 %v1297_v39  ;;  %v1340_v4 = vand.u32 2147483648, %v1297_v39  ;;  %v1338_v8 = vand.u32 2147483647, %v1297_v39  ;;  %vm1334_vm2 = vweird.f32 %v1297_v39 }
 0x2ac   : > { %1704 = vrcp.f32 %v1298_v43  ;;  %v1355_v9 = vand.u32 2147483648, %v1298_v43  ;;  %v1353_v6 = vand.u32 2147483647, %v1298_v43  ;;  %vm1349_vm4 = vweird.f32 %v1298_v43 }
 0x2ad   : > { %v1341_v24 = vor.u32 1.1754944e-38, %v1340_v4  ;;  %vm1339_vm5 = vcmp.eq.f32.partialorder %v1338_v8, 8.507059e+37  ;;  %v1367_v14 = vsel %vm1366_vm13, %v1312_v19, %v1363_v41 }
 0x2ae   : > { %v1356_v25 = vor.u32 1.1754944e-38, %v1355_v9  ;;  %vm1354_vm7 = vcmp.eq.f32.partialorder %v1353_v6, 8.507059e+37 }
 0x2b1   : > { %v1703_v51 = vpop.eup %1702 }
 0x2b2   : > { %v1705_v33 = vpop.eup %1704  ;;  %v1330_v54 = vmul.f32 %v1703_v51, %v1297_v39  ;;  %vm1335_vm14 = vweird.f32 %v1703_v51 }
 0x2b3   : > { %v1345_v55 = vmul.f32 %v1705_v33, %v1298_v43  ;;  %vm1350_vm0 = vweird.f32 %v1705_v33  ;;  %vm1336_vm3 = vmor %vm1334_vm2, %vm1335_vm14 }
 0x2b4   : > { %v1331_v59 = vsub.f32 1.0, %v1330_v54  ;;  %vm1351_vm6 = vmor %vm1349_vm4, %vm1350_vm0 }
 0x2b5   : > { %v1346_v2 = vsub.f32 1.0, %v1345_v55 }
 0x2b6   : > { %v1332_v5 = vmul.f32 %v1703_v51, %v1331_v59 }
 0x2b7   : > { %v1347_v44 = vmul.f32 %v1705_v33, %v1346_v2 }
 0x2b8   : > { %v1333_v20 = vadd.f32 %v1703_v51, %v1332_v5 }
 0x2b9   : > { %v1348_v40 = vadd.f32 %v1705_v33, %v1347_v44 }
 0x2ba   : > { %v1337_v31 = vsel %vm1336_vm3, %v1703_v51, %v1333_v20 }
 0x2bb   : > { %v1342_v26 = vsel %vm1339_vm5, %v1341_v24, %v1337_v31  ;;  %v1352_v22 = vsel %vm1351_vm6, %v1705_v33, %v1348_v40 }
 0x2bc   : > { %v1357_v18 = vsel %vm1354_vm7, %v1356_v25, %v1352_v22  ;;  %v1364_v42 = vrot.slane %v1342_v26, 6 }
 0x2bd   : > { %v1365_v49 = vrot.slane %v1357_v18, 5 }
 0x2bf   : > { %v1369_v11 = vsel %vm1368_vm8, %v1364_v42, %v1365_v49 }
 0x2c0   : > { %v1371_v15 = vsel %vm1370_vm10, %v1367_v14, %v1369_v11 }
 0x2c1   : > { %1377 = vst.msk [vmem:[%s274_s18] sm:$0xf] %vm1375_vm11, %v1371_v15 }
 0x2c2   : > { %1763 = shalt.err (!%p1760_p8)
}
 0x2c3   : > { %1636 = dma.vmem_to_hbm [thread:$0]  (%p1883_p5), %s1392_s16, 64, %s1394_s19, %s1379_s20  }
 0x2c4 PF: > { %p1648_p9 = scmp.ge.s32.totalorder %s1802_s24, 2  ;;  %s1405_s12 = sand.u32 1, %s1790_s21  }
 0x2c5   : > { %s1406_s13 = scalar_lea.sflag [#allocation4], %s1405_s12 }
 0x2c6   : > { %p1643_p10 = pnand %p1648_p9, %p1887_p6 }
 0x2c8   : > { %p1644_p11 = pneg %p1643_p10 }
 0x2ca   : > { %1785 = dma.done.wait (%p1644_p11), %s1406_s13, 64  }
 0x2cb   : > { %1787 = vsyncadd (%p1644_p11), %s1406_s13, 4294967232  ;;  %p17_p12 = scmp.ge.s32.totalorder %s1870_s27, 4   ;;  %s2315_s21 = smov %s1794_s22 }
 0x2cc   : > { %s2316_s22 = smov %s1798_s23  ;;  %s2317_s23 = smov %s1881_s30 }
 0x2cd   : > { %s2318_s24 = smov %s1870_s27  ;;  %19 = sbr.rel (!%p17_p12) target bundleno = 4 (0x4), region = 88 }
 0x2d2   :  { %1412 = vsyncpa [#allocation3], 1 }
 0x2d3   :  { %1414 = vsyncpa [#allocation3 + $0x1], 1 }
 0x2d4   :  { %1415 = vsyncpa [#allocation4], 1 }
 0x2d5   :  { %1417 = vsyncpa [#allocation4 + $0x1], 1 }

// kernel: tpu_custom_call.1
= control target key start
LH: loop header
LB: loop body
LE: loop exit
PB: predicated region body
PF: predicated region fallthrough
CT: control target
= control target key end

     0   :  { %11 = vsyncpa [#allocation3], 0  ;;  %s2302_s0 = inlined_call_operand.vmem [shape: s32[1,1024], index: 0, kind: input, shape index: {}]   ;;  %s2303_s1 = inlined_call_operand.vmem [shape: s32[1,1024], index: 1, kind: input, shape index: {}]   ;;  %s2304_s2 = inlined_call_operand.vmem [shape: f32[32,24], index: 2, kind: input, shape index: {}]   ;;  %s2305_s3 = inlined_call_operand.vmem [shape: f32[32,12], index: 3, kind: input, shape index: {}]   ;;  %s2306_s4 = inlined_call_operand.hbm [shape: f32[2,72,72], index: 4, kind: input, shape index: {}]   ;;  %s2307_s5 = inlined_call_operand.vmem [shape: f32[72,1], index: 5, kind: input, shape index: {}]   ;;  %s2308_s6 = inlined_call_operand.hbm [shape: f32[1,1024], index: 6, kind: output, shape index: {}]  }
   0x1   :  { %12 = vsyncpa [#allocation4], 0 }
   0x2   :  { %14 = vsyncpa [#allocation4 + $0x1], 0  ;;  %s1845_s21 = smov 0   ;;  %s1847_s22 = smov 0  }
   0x3   :  { %s1849_s23 = smov 0   ;;  %s1851_s24 = smov 0  }
   0x4 LB: > { %s1866_s25 = sadd.s32 4294967295, %s1802_s24   ;;  %s1471_s26 = sadd.s32 4294967294, %s1802_s24   ;;  %s1802_s24 = sphi %s1851_s24, %s2318_s24   ;;  %s1798_s23 = sphi %s1849_s23, %s2317_s23   ;;  %s1794_s22 = sphi %s1847_s22, %s2316_s22   ;;  %s1790_s21 = sphi %s1845_s21, %s2315_s21  }
   0x5   : > { %s1870_s27 = sadd.s32 1, %s1802_s24   ;;  %s163_s28 = sadd.s32 1, %s1798_s23 }
   0x6   : > { %s160_s29 = ssub.s32 %s1802_s24, %s1870_s27  ;;  %p173_p0 = scmp.ne.s32.totalorder %s1798_s23, %s1794_s22 }
   0x7   : > { %p161_p1 = scmp.eq.s32.totalorder %s160_s29, 0  ;;  %p174_p2 = scmp.eq.s32.totalorder %s1866_s25, 1 }
   0x8   : > { %p179_p3 = scmp.ne.s32.totalorder %s1794_s22, %s1790_s21  ;;  %p180_p4 = scmp.eq.s32.totalorder %s1471_s26, 1 }
   0x9   : > { %s1881_s30 = scalar_select %p161_p1, %s1798_s23, %s163_s28  }
   0xa   : > { %p1883_p5 = por %p174_p2, %p173_p0  ;;  %p1887_p6 = por %p180_p4, %p179_p3 }
   0xb   : > { %p1472_p7 = scmp.ge.s32.totalorder %s1802_s24, 1  ;;  %p187_p8 = scmp.lt.s32.totalorder %s1802_s24, 3 }
   0xc   : > { %p1646_p9 = scmp.eq.s32.totalorder %s1866_s25, 0  ;;  %s204_s11 = sshll.u32 %s2306_s4, 4  ;;  %s205_s11 = int_to_ptr.hbm [resolvable:$true] %s204_s11 }
   0xd   : > { %p188_p10 = pnand %p1472_p7, %p187_p8  ;;  %s1804_s12 = smov [#allocation2]  }
   0xe   : > { %s206_s13 = sshll.u32 %s1804_s12, 4  ;;  %s1805_s14 = smov 128   ;;  %s207_s13 = int_to_ptr.vmem [resolvable:$true] %s206_s13 }
   0xf   : > { %p1638_p11 = pneg %p188_p10  ;;  %s1806_s15 = smov 8  }
  0x10   : > { %241 = sbr.rel (%p188_p10) target bundleno = 708 (0x2c4), region = 44 }
  0x11   : > { %p1639_p12 = pnand %p1646_p9, %p1638_p11 }
  0x13   : > { %1641 = dma.hbm_to_vmem [thread:$0]  (!%p1639_p12), %s205_s11, 2304, %s207_s13, [#allocation3], %s1805_s14, %s1805_s14, %s1806_s15  }
  0x15   : > { %1781 = dma.done.wait (%p1646_p9), [#allocation3], 2304  }
  0x16   : > { %1783 = vsyncadd (%p1646_p9), [#allocation3], 4294964992  ;;  %s1904_s16 = sshll.u32 %s1866_s25, 2  ;;  %v286_v0 = vlaneseq  ;;  %v1807_v10 = vmov 1.0   ;;  %v360_v12 = vld [vmem:[%s2304_s2] sm:$0xff]  ;;  %vm364_vm13 = vcmask 195584  }
  0x17   : > { %p276_p13 = scmp.lt.s32.totalorder %s1904_s16, 7  ;;  %vm510_vm14 = vcmask 1043456   ;;  %v1808_v16 = vmov 0.0   ;;  %v361_v21 = vld [vmem:[%s2304_s2 + $0x8] sm:$0xff]  ;;  %v362_v22 = vld [vmem:[%s2304_s2 + $0x10] sm:$0xff]  ;;  %v363_v23 = vld [vmem:[%s2304_s2 + $0x18] sm:$0xff] }
  0x18   : > { %v287_v1 = vshrl.u32 %v286_v0, 7  ;;  %v493_v24 = vld [vmem:[%s2305_s3] sm:$0xff]  ;;  %v494_v25 = vld [vmem:[%s2305_s3 + $0x8] sm:$0xff]  ;;  %v495_v26 = vld [vmem:[%s2305_s3 + $0x10] sm:$0xff]  ;;  %s272_s12 = sand.u32 1, %s1794_s22   ;;  %s1756_s9 = scalar_lea.hbm %s2308_s6, 8 }
  0x19   : > { %s277_s17 = scalar_select %p276_p13, %s1904_s16, 7  ;;  %v496_v27 = vld [vmem:[%s2305_s3 + $0x18] sm:$0xff]  ;;  %v639_v60 = vld [vmem:[#allocation2] sm:$0xff]  ;;  %v640_v61 = vld [vmem:[#allocation2 + $0x8] sm:$0xff] }
  0x1a   : > { %v289_v2 = vadd.s32 16, %v287_v1  ;;  %v288_v4 = vadd.s32 8, %v287_v1  ;;  %v641_v62 = vld [vmem:[#allocation2 + $0x10] sm:$0xff]  ;;  %v642_v63 = vld [vmem:[#allocation2 + $0x18] sm:$0xff]  ;;  %s2250_s13 = sshll.u32 %s272_s12, 2 }
  0x1b   : > { %s278_s20 = scalar_lea.vmem %s2302_s0, %s277_s17  ;;  %s283_s29 = scalar_lea.vmem %s2303_s1, %s277_s17 }
  0x1c   : > { %v290_v3 = vld [vmem:[%s278_s20] sm:$0xf]  ;;  %s1389_s17 = scalar_lea.hbm %s2308_s6, %s1904_s16  ;;  %s274_s18 = scalar_lea.vmem [#allocation5], %s2250_s13 }
  0x1d   : > { %v291_v5 = vperm.slane %v290_v3, 0  ;;  %v292_v6 = vperm.slane %v290_v3, 1  ;;  %v293_v7 = vperm.slane %v290_v3, 2  ;;  %v294_v8 = vperm.slane %v290_v3, 3  ;;  %v331_v9 = vld [vmem:[%s283_s29] sm:$0xf] }
  0x1e   : > { %v332_v11 = vperm.slane %v331_v9, 0  ;;  %v333_v13 = vperm.slane %v331_v9, 1  ;;  %v334_v14 = vperm.slane %v331_v9, 2  ;;  %v335_v15 = vperm.slane %v331_v9, 3  ;;  %v645_v3 = vld [vmem:[#allocation2 + $0x30] sm:$0xff]  ;;  %s1391_s16 = sshll.u32 %s274_s18, 4  ;;  %s1392_s16 = int_to_ptr.vmem [resolvable:$true] %s1391_s16 }
  0x1f   : > { %vm303_vm0 = vcmp.eq.s32.totalorder %v289_v2, %v291_v5  ;;  %vm304_vm1 = vcmp.eq.s32.totalorder %v289_v2, %v292_v6  ;;  %vm305_vm2 = vcmp.eq.s32.totalorder %v289_v2, %v293_v7  ;;  %vm306_vm3 = vcmp.eq.s32.totalorder %v289_v2, %v294_v8  ;;  %v644_v2 = vld [vmem:[#allocation2 + $0x28] sm:$0xff]  ;;  %s1393_s19 = sshll.u32 %s1389_s17, 4  ;;  %s1379_s20 = scalar_lea.sflag [#allocation4], %s272_s12  ;;  %s1394_s19 = int_to_ptr.hbm [resolvable:$true] %s1393_s19 }
  0x20   : > { %1500 = vmatpush.msk.msra.mxu0 %vm303_vm0, %v1807_v10  ;;  %1507 = vmatpush.msk.msra.mxu1 %vm304_vm1, %v1807_v10  ;;  %vm299_vm4 = vcmp.eq.s32.totalorder %v288_v4, %v291_v5  ;;  %vm300_vm5 = vcmp.eq.s32.totalorder %v288_v4, %v292_v6  ;;  %vm301_vm6 = vcmp.eq.s32.totalorder %v288_v4, %v293_v7  ;;  %s1750_s26 = sshra.s32 %s1394_s19, 4  ;;  %s1751_s26 = int_to_ptr.hbm [resolvable:$true] %s1750_s26 }
  0x21   : > { %1514 = vmatpush.msk.msra.mxu2 %vm305_vm2, %v1807_v10  ;;  %1521 = vmatpush.msk.msra.mxu3 %vm306_vm3, %v1807_v10  ;;  %vm302_vm7 = vcmp.eq.s32.totalorder %v288_v4, %v294_v8  ;;  %vm295_vm8 = vcmp.eq.s32.totalorder %v287_v1, %v291_v5  ;;  %vm296_vm9 = vcmp.eq.s32.totalorder %v287_v1, %v292_v6  ;;  %v647_v5 = vld [vmem:[#allocation2 + $0x40] sm:$0xff]  ;;  %s1752_s28 = scalar_lea.hbm %s1751_s26, 4  ;;  %p1757_p3 = scmp.lt.s32.totalorder %s1751_s26, %s2308_s6 }
  0x22   : > { %1501 = vmatpush.msk.msra.mxu0 %vm299_vm4, %v1807_v10  ;;  %1508 = vmatpush.msk.msra.mxu1 %vm300_vm5, %v1807_v10  ;;  %vm297_vm10 = vcmp.eq.s32.totalorder %v287_v1, %v293_v7  ;;  %vm298_vm11 = vcmp.eq.s32.totalorder %v287_v1, %v294_v8  ;;  %vm340_vm12 = vcmp.eq.s32.totalorder %v288_v4, %v332_v11  ;;  %p1753_p0 = scmp.ne.s32.totalorder %s1751_s26, %s1752_s28  ;;  %p1758_p4 = scmp.lt.s32.totalorder %s1756_s9, %s1752_s28 }
  0x23   : > { %1515 = vmatpush.msk.msra.mxu2 %vm301_vm6, %v1807_v10  ;;  %1522 = vmatpush.msk.msra.mxu3 %vm302_vm7, %v1807_v10  ;;  %v1496_v17 = vsel %vm340_vm12, 1.0, %v1808_v16  ;;  %vm341_vm15 = vcmp.eq.s32.totalorder %v288_v4, %v333_v13  ;;  %vm342_vm0 = vcmp.eq.s32.totalorder %v288_v4, %v334_v14  ;;  %vm343_vm1 = vcmp.eq.s32.totalorder %v288_v4, %v335_v15  ;;  %v646_v4 = vld [vmem:[#allocation2 + $0x38] sm:$0xff] }
  0x24   : > { %1502 = vmatpush.msk.msra.mxu0 %vm295_vm8, %v1807_v10  ;;  %1509 = vmatpush.msk.msra.mxu1 %vm296_vm9, %v1807_v10  ;;  %v1497_v18 = vsel %vm341_vm15, 1.0, %v1808_v16  ;;  %v1498_v19 = vsel %vm342_vm0, 1.0, %v1808_v16  ;;  %v1499_v20 = vsel %vm343_vm1, 1.0, %v1808_v16  ;;  %vm336_vm2 = vcmp.eq.s32.totalorder %v287_v1, %v332_v11  ;;  %p1754_p1 = pnand %p1753_p0, %p1883_p5  ;;  %p1759_p7 = por %p1758_p4, %p1757_p3 }
  0x25   : > { %1516 = vmatpush.msk.msra.mxu2 %vm297_vm10, %v1807_v10  ;;  %1523 = vmatpush.msk.msra.mxu3 %vm298_vm11, %v1807_v10  ;;  %vm337_vm3 = vcmp.eq.s32.totalorder %v287_v1, %v333_v13  ;;  %vm338_vm4 = vcmp.eq.s32.totalorder %v287_v1, %v334_v14  ;;  %vm339_vm5 = vcmp.eq.s32.totalorder %v287_v1, %v335_v15  ;;  %vm497_vm6 = vcmask 97280   ;;  %v643_v1 = vld [vmem:[#allocation2 + $0x20] sm:$0xff] }
  0x26   : > { %1503 = vmatmul.msk.f32.vlgmr.msra.gmra.mxu0 %vm364_vm13, %v360_v12  ;;  %1510 = vmatmul.msk.f32.vlgmr.msra.gmra.mxu1 %vm364_vm13, %v360_v12  ;;  %vm648_vm7 = vcmask 588800   ;;  %p1755_p2 = pneg %p1754_p1 }
  0x27   : > { %1517 = vmatmul.msk.f32.vlgmr.msra.gmra.mxu2 %vm364_vm13, %v360_v12  ;;  %1524 = vmatmul.msk.f32.vlgmr.msra.gmra.mxu3 %vm364_vm13, %v360_v12 }
  0x28   : > { %1528 = vmatpush.msk.msrb.mxu0 %vm510_vm14, %v1496_v17  ;;  %1534 = vmatpush.msk.msrb.mxu1 %vm510_vm14, %v1497_v18  ;;  %p1760_p8 = pnand %p1759_p7, %p1755_p2 }
  0x29   : > { %1540 = vmatpush.msk.msrb.mxu2 %vm510_vm14, %v1498_v19  ;;  %1546 = vmatpush.msk.msrb.mxu3 %vm510_vm14, %v1499_v20 }
  0x2a   : > { %1529 = vmatpush.msk.msrb.mxu0 %vm336_vm2, %v1807_v10  ;;  %1535 = vmatpush.msk.msrb.mxu1 %vm337_vm3, %v1807_v10 }
  0x2b   : > { %1541 = vmatpush.msk.msrb.mxu2 %vm338_vm4, %v1807_v10  ;;  %1547 = vmatpush.msk.msrb.mxu3 %vm339_vm5, %v1807_v10 }
  0x2c   : > { %683 = vmatpush.msra.mxu0 %v1807_v10  ;;  %727 = vmatpush.msra.mxu1 %v1807_v10 }
  0x2d   : > { %771 = vmatpush.msra.mxu2 %v1807_v10  ;;  %815 = vmatpush.msra.mxu3 %v1807_v10 }
  0x2e   : > { %1504 = vmatmul.msk.f32.gmra.mxu0 %vm364_vm13, %v361_v21  ;;  %1511 = vmatmul.msk.f32.gmra.mxu1 %vm364_vm13, %v361_v21 }
  0x2f   : > { %1518 = vmatmul.msk.f32.gmra.mxu2 %vm364_vm13, %v361_v21  ;;  %1525 = vmatmul.msk.f32.gmra.mxu3 %vm364_vm13, %v361_v21 }
  0x36   : > { %1505 = vmatmul.msk.f32.gmra.mxu0 %vm364_vm13, %v362_v22  ;;  %1512 = vmatmul.msk.f32.gmra.mxu1 %vm364_vm13, %v362_v22 }
  0x37   : > { %1519 = vmatmul.msk.f32.gmra.mxu2 %vm364_vm13, %v362_v22  ;;  %1526 = vmatmul.msk.f32.gmra.mxu3 %vm364_vm13, %v362_v22 }
  0x3e   : > { %1506 = vmatmul.msk.f32.gmra.mxu0 %vm364_vm13, %v363_v23  ;;  %1513 = vmatmul.msk.f32.gmra.mxu1 %vm364_vm13, %v363_v23 }
  0x3f   : > { %1520 = vmatmul.msk.f32.gmra.mxu2 %vm364_vm13, %v363_v23  ;;  %1527 = vmatmul.msk.f32.gmra.mxu3 %vm364_vm13, %v363_v23  ;;  %vm1366_vm13 = vcmask 1040384  }
  0x46   : > { %1530 = vmatmul.msk.f32.vlgmr.msrb.gmra.mxu0 %vm497_vm6, %v493_v24  ;;  %1536 = vmatmul.msk.f32.vlgmr.msrb.gmra.mxu1 %vm497_vm6, %v493_v24 }
  0x47   : > { %1542 = vmatmul.msk.f32.vlgmr.msrb.gmra.mxu2 %vm497_vm6, %v493_v24  ;;  %1548 = vmatmul.msk.f32.vlgmr.msrb.gmra.mxu3 %vm497_vm6, %v493_v24 }
  0x4e   : > { %1531 = vmatmul.msk.f32.gmra.mxu0 %vm497_vm6, %v494_v25  ;;  %1537 = vmatmul.msk.f32.gmra.mxu1 %vm497_vm6, %v494_v25 }
  0x4f   : > { %1543 = vmatmul.msk.f32.gmra.mxu2 %vm497_vm6, %v494_v25  ;;  %1549 = vmatmul.msk.f32.gmra.mxu3 %vm497_vm6, %v494_v25 }
  0x56   : > { %1532 = vmatmul.msk.f32.gmra.mxu0 %vm497_vm6, %v495_v26  ;;  %1538 = vmatmul.msk.f32.gmra.mxu1 %vm497_vm6, %v495_v26 }
  0x57   : > { %1544 = vmatmul.msk.f32.gmra.mxu2 %vm497_vm6, %v495_v26  ;;  %1550 = vmatmul.msk.f32.gmra.mxu3 %vm497_vm6, %v495_v26 }
  0x5e   : > { %1533 = vmatmul.msk.f32.gmra.mxu0 %vm497_vm6, %v496_v27  ;;  %1539 = vmatmul.msk.f32.gmra.mxu1 %vm497_vm6, %v496_v27 }
  0x5f   : > { %1545 = vmatmul.msk.f32.gmra.mxu2 %vm497_vm6, %v496_v27  ;;  %1551 = vmatmul.msk.f32.gmra.mxu3 %vm497_vm6, %v496_v27 }
  0xa3   : > { %v394_v28 = vpop.f32.mrf.mxu0  ;;  %v423_v29 = vpop.f32.mrf.mxu1 }
  0xaa   : > { %v1975_v30 = vpop.f32.mrf.mxu2  ;;  %v1977_v31 = vpop.f32.mrf.mxu3 }
  0xab   : > { %v397_v32 = vpop.f32.mrf.mxu0  ;;  %v426_v33 = vpop.f32.mrf.mxu1 }
  0xb2   : > { %v455_v34 = vpop.f32.mrf.mxu2  ;;  %v484_v35 = vpop.f32.mrf.mxu3 }
  0xb3   : > { %v400_v36 = vpop.f32.mrf.mxu0  ;;  %v429_v37 = vpop.f32.mrf.mxu1 }
  0xba   : > { %v458_v38 = vpop.f32.mrf.mxu2  ;;  %v487_v39 = vpop.f32.mrf.mxu3 }
  0xbb   : > { %v403_v40 = vpop.f32.mrf.mxu0  ;;  %v432_v41 = vpop.f32.mrf.mxu1 }
  0xc2   : > { %v461_v42 = vpop.f32.mrf.mxu2  ;;  %v490_v43 = vpop.f32.mrf.mxu3 }
  0xc3   : > { %v540_v44 = vpop.f32.mrf.mxu0  ;;  %v569_v45 = vpop.f32.mrf.mxu1 }
  0xca   : > { %v598_v46 = vpop.f32.mrf.mxu2  ;;  %v627_v47 = vpop.f32.mrf.mxu3 }
  0xcb   : > { %v543_v48 = vpop.f32.mrf.mxu0  ;;  %v572_v49 = vpop.f32.mrf.mxu1 }
  0xd2   : > { %v601_v50 = vpop.f32.mrf.mxu2  ;;  %v630_v51 = vpop.f32.mrf.mxu3 }
  0xd3   : > { %v546_v52 = vpop.f32.mrf.mxu0  ;;  %v575_v53 = vpop.f32.mrf.mxu1 }
  0xda   : > { %v604_v54 = vpop.f32.mrf.mxu2  ;;  %v633_v55 = vpop.f32.mrf.mxu3 }
  0xdb   : > { %v549_v56 = vpop.f32.mrf.mxu0  ;;  %v578_v57 = vpop.f32.mrf.mxu1 }
  0xdc   : > { %684 = vmatpush.msra.mxu0 %v549_v56  ;;  %728 = vmatpush.msra.mxu1 %v578_v57 }
  0xde   : > { %685 = vmatpush.msra.mxu0 %v546_v52  ;;  %729 = vmatpush.msra.mxu1 %v575_v53  ;;  %v1137_v52 = vld [vmem:[%s2307_s5] sm:$0xff] }
  0xe0   : > { %686 = vmatpush.msra.mxu0 %v543_v48  ;;  %730 = vmatpush.msra.mxu1 %v572_v49 }
  0xe2   : > { %v607_v58 = vpop.f32.mrf.mxu2  ;;  %v636_v59 = vpop.f32.mrf.mxu3  ;;  %687 = vmatpush.msra.mxu0 %v540_v44  ;;  %731 = vmatpush.msra.mxu1 %v569_v45 }
  0xe3   : > { %772 = vmatpush.msra.mxu2 %v607_v58  ;;  %816 = vmatpush.msra.mxu3 %v636_v59 }
  0xe4   : > { %688 = vmatpush.msra.mxu0 %v403_v40  ;;  %732 = vmatpush.msra.mxu1 %v432_v41 }
  0xe5   : > { %773 = vmatpush.msra.mxu2 %v604_v54  ;;  %817 = vmatpush.msra.mxu3 %v633_v55  ;;  %v1809_v55 = vmov 0  }
  0xe6   : > { %689 = vmatpush.msra.mxu0 %v400_v36  ;;  %733 = vmatpush.msra.mxu1 %v429_v37 }
  0xe7   : > { %774 = vmatpush.msra.mxu2 %v601_v50  ;;  %818 = vmatpush.msra.mxu3 %v630_v51 }
  0xe8   : > { %690 = vmatpush.msra.mxu0 %v397_v32  ;;  %734 = vmatpush.msra.mxu1 %v426_v33 }
  0xe9   : > { %775 = vmatpush.msra.mxu2 %v598_v46  ;;  %819 = vmatpush.msra.mxu3 %v627_v47 }
  0xea   : > { %691 = vmatpush.msra.mxu0 %v394_v28  ;;  %735 = vmatpush.msra.mxu1 %v423_v29 }
  0xeb   : > { %776 = vmatpush.msra.mxu2 %v461_v42  ;;  %820 = vmatpush.msra.mxu3 %v490_v43 }
  0xec   : > { %1552 = vmatmul.msk.f32.vlgmr.msra.gmra.mxu0 %vm648_vm7, %v639_v60  ;;  %1561 = vmatmul.msk.f32.vlgmr.msra.gmra.mxu1 %vm648_vm7, %v639_v60 }
  0xed   : > { %777 = vmatpush.msra.mxu2 %v458_v38  ;;  %821 = vmatpush.msra.mxu3 %v487_v39 }
  0xee   : > { %1687 = vset.pattern.permute.xlu0 %v1809_v55  ;;  %1688 = vset.pattern.permute.xlu1 %v1809_v55 }
  0xef   : > { %778 = vmatpush.msra.mxu2 %v455_v34  ;;  %822 = vmatpush.msra.mxu3 %v484_v35 }
  0xf0   : > { %1148 = vperm.xlu0 %1687, %v1137_v52   ;;  %1689 = vset.pattern.permute.xlu2 %v1809_v55 }
  0xf1   : > { %779 = vmatpush.msra.mxu2 %v1975_v30  ;;  %823 = vmatpush.msra.mxu3 %v1977_v31 }
  0xf2   : > { %1570 = vmatmul.msk.f32.vlgmr.msra.gmra.mxu2 %vm648_vm7, %v639_v60  ;;  %1579 = vmatmul.msk.f32.vlgmr.msra.gmra.mxu3 %vm648_vm7, %v639_v60 }
  0xf4   : > { %1553 = vmatmul.msk.f32.gmra.mxu0 %vm648_vm7, %v640_v61  ;;  %1562 = vmatmul.msk.f32.gmra.mxu1 %vm648_vm7, %v640_v61 }
  0xfa   : > { %1571 = vmatmul.msk.f32.gmra.mxu2 %vm648_vm7, %v640_v61  ;;  %1580 = vmatmul.msk.f32.gmra.mxu3 %vm648_vm7, %v640_v61 }
  0xfc   : > { %1554 = vmatmul.msk.f32.gmra.mxu0 %vm648_vm7, %v641_v62  ;;  %1563 = vmatmul.msk.f32.gmra.mxu1 %vm648_vm7, %v641_v62 }
 0x102   : > { %1572 = vmatmul.msk.f32.gmra.mxu2 %vm648_vm7, %v641_v62  ;;  %1581 = vmatmul.msk.f32.gmra.mxu3 %vm648_vm7, %v641_v62 }
 0x104   : > { %1555 = vmatmul.msk.f32.gmra.mxu0 %vm648_vm7, %v642_v63  ;;  %1564 = vmatmul.msk.f32.gmra.mxu1 %vm648_vm7, %v642_v63 }
 0x10a   : > { %1573 = vmatmul.msk.f32.gmra.mxu2 %vm648_vm7, %v642_v63  ;;  %1582 = vmatmul.msk.f32.gmra.mxu3 %vm648_vm7, %v642_v63 }
 0x10c   : > { %1556 = vmatmul.msk.f32.gmra.mxu0 %vm648_vm7, %v643_v1  ;;  %1565 = vmatmul.msk.f32.gmra.mxu1 %vm648_vm7, %v643_v1 }
 0x112   : > { %1574 = vmatmul.msk.f32.gmra.mxu2 %vm648_vm7, %v643_v1  ;;  %1583 = vmatmul.msk.f32.gmra.mxu3 %vm648_vm7, %v643_v1 }
 0x114   : > { %1557 = vmatmul.msk.f32.gmra.mxu0 %vm648_vm7, %v644_v2  ;;  %1566 = vmatmul.msk.f32.gmra.mxu1 %vm648_vm7, %v644_v2 }
 0x11a   : > { %1575 = vmatmul.msk.f32.gmra.mxu2 %vm648_vm7, %v644_v2  ;;  %1584 = vmatmul.msk.f32.gmra.mxu3 %vm648_vm7, %v644_v2 }
 0x11c   : > { %1558 = vmatmul.msk.f32.gmra.mxu0 %vm648_vm7, %v645_v3  ;;  %1567 = vmatmul.msk.f32.gmra.mxu1 %vm648_vm7, %v645_v3 }
 0x122   : > { %1576 = vmatmul.msk.f32.gmra.mxu2 %vm648_vm7, %v645_v3  ;;  %1585 = vmatmul.msk.f32.gmra.mxu3 %vm648_vm7, %v645_v3 }
 0x124   : > { %1559 = vmatmul.msk.f32.gmra.mxu0 %vm648_vm7, %v646_v4  ;;  %1568 = vmatmul.msk.f32.gmra.mxu1 %vm648_vm7, %v646_v4 }
 0x12a   : > { %1577 = vmatmul.msk.f32.gmra.mxu2 %vm648_vm7, %v646_v4  ;;  %1586 = vmatmul.msk.f32.gmra.mxu3 %vm648_vm7, %v646_v4 }
 0x12c   : > { %1560 = vmatmul.msk.f32.gmra.mxu0 %vm648_vm7, %v647_v5  ;;  %1569 = vmatmul.msk.f32.gmra.mxu1 %vm648_vm7, %v647_v5 }
 0x132   : > { %1578 = vmatmul.msk.f32.gmra.mxu2 %vm648_vm7, %v647_v5  ;;  %1587 = vmatmul.msk.f32.gmra.mxu3 %vm648_vm7, %v647_v5  ;;  %v889_v5 = vld [vmem:[#allocation2 + $0x48] sm:$0xff] }
 0x169   : > { %v2017_v6 = vpop.f32.mrf.mxu0  ;;  %v2019_v7 = vpop.f32.mrf.mxu1 }
 0x16a   : > { %v852_v1 = vmax.f32 %v2017_v6, 0.0  ;;  %v853_v2 = vmax.f32 %v2019_v7, 0.0  ;;  %v1139_v6 = vld [vmem:[%s2307_s5 + $0x10] sm:$0xff]  ;;  %v1138_v7 = vld [vmem:[%s2307_s5 + $0x8] sm:$0xff] }
 0x16b   : > { %1158 = vperm.xlu1 %1688, %v1139_v6   ;;  %1153 = vperm.xlu0 %1687, %v1138_v7  }
 0x171   : > { %v2021_v8 = vpop.f32.mrf.mxu0  ;;  %v2023_v9 = vpop.f32.mrf.mxu1 }
 0x172   : > { %v856_v60 = vmax.f32 %v2021_v8, 0.0  ;;  %v857_v61 = vmax.f32 %v2023_v9, 0.0 }
 0x175   : > { %v2025_v10 = vpop.f32.mrf.mxu2  ;;  %v2027_v11 = vpop.f32.mrf.mxu3 }
 0x179   : > { %v2029_v12 = vpop.f32.mrf.mxu0  ;;  %v2031_v13 = vpop.f32.mrf.mxu1 }
 0x17a   : > { %v860_v56 = vmax.f32 %v2029_v12, 0.0  ;;  %v861_v57 = vmax.f32 %v2031_v13, 0.0 }
 0x17d   : > { %v2033_v14 = vpop.f32.mrf.mxu2  ;;  %v2035_v15 = vpop.f32.mrf.mxu3 }
 0x181   : > { %v702_v16 = vpop.f32.mrf.mxu0  ;;  %v746_v17 = vpop.f32.mrf.mxu1 }
 0x182   : > { %v864_v50 = vmax.f32 %v702_v16, 0.0  ;;  %v865_v51 = vmax.f32 %v746_v17, 0.0 }
 0x185   : > { %v2037_v18 = vpop.f32.mrf.mxu2  ;;  %v2039_v19 = vpop.f32.mrf.mxu3 }
 0x189   : > { %v705_v20 = vpop.f32.mrf.mxu0  ;;  %v749_v21 = vpop.f32.mrf.mxu1 }
 0x18a   : > { %v868_v48 = vmax.f32 %v705_v20, 0.0  ;;  %v869_v49 = vmax.f32 %v749_v21, 0.0  ;;  %v862_v20 = vmax.f32 %v2037_v18, 0.0  ;;  %v863_v21 = vmax.f32 %v2039_v19, 0.0 }
 0x18b   : > { %v854_v18 = vmax.f32 %v2025_v10, 0.0  ;;  %v855_v19 = vmax.f32 %v2027_v11, 0.0  ;;  %v892_v10 = vld [vmem:[#allocation2 + $0x60] sm:$0xff]  ;;  %v1143_v11 = vld [vmem:[%s2307_s5 + $0x30] sm:$0xff] }
 0x18c   : > { %1178 = vperm.xlu0 %1687, %v1143_v11  }
 0x18d   : > { %v2041_v22 = vpop.f32.mrf.mxu2  ;;  %v2043_v23 = vpop.f32.mrf.mxu3 }
 0x18e   : > { %v866_v16 = vmax.f32 %v2041_v22, 0.0  ;;  %v867_v17 = vmax.f32 %v2043_v23, 0.0  ;;  %v1140_v22 = vld [vmem:[%s2307_s5 + $0x18] sm:$0xff] }
 0x18f   : > { %1163 = vperm.xlu1 %1688, %v1140_v22   ;;  %v1144_v23 = vld [vmem:[%s2307_s5 + $0x38] sm:$0xff] }
 0x191   : > { %v708_v24 = vpop.f32.mrf.mxu0  ;;  %v752_v25 = vpop.f32.mrf.mxu1 }
 0x192   : > { %v872_v46 = vmax.f32 %v708_v24, 0.0  ;;  %v873_v47 = vmax.f32 %v752_v25, 0.0  ;;  %v890_v24 = vld [vmem:[#allocation2 + $0x50] sm:$0xff]  ;;  %v858_v25 = vmax.f32 %v2033_v14, 0.0  ;;  %v891_v14 = vld [vmem:[#allocation2 + $0x58] sm:$0xff] }
 0x195   : > { %v2045_v26 = vpop.f32.mrf.mxu2  ;;  %v2047_v27 = vpop.f32.mrf.mxu3 }
 0x196   : > { %v870_v12 = vmax.f32 %v2045_v26, 0.0  ;;  %v871_v13 = vmax.f32 %v2047_v27, 0.0  ;;  %v859_v26 = vmax.f32 %v2035_v15, 0.0  ;;  %v893_v15 = vld [vmem:[#allocation2 + $0x68] sm:$0xff]  ;;  %v1141_v27 = vld [vmem:[%s2307_s5 + $0x20] sm:$0xff] }
 0x197   : > { %1183 = vperm.xlu1 %1688, %v1144_v23   ;;  %1168 = vperm.xlu2 %1689, %v1141_v27  }
 0x199   : > { %v711_v28 = vpop.f32.mrf.mxu0  ;;  %v755_v29 = vpop.f32.mrf.mxu1 }
 0x19a   : > { %v876_v42 = vmax.f32 %v711_v28, 0.0  ;;  %v877_v45 = vmax.f32 %v755_v29, 0.0  ;;  %v894_v28 = vld [vmem:[#allocation2 + $0x70] sm:$0xff]  ;;  %v1142_v29 = vld [vmem:[%s2307_s5 + $0x28] sm:$0xff] }
 0x19d   : > { %v2049_v30 = vpop.f32.mrf.mxu2  ;;  %v2051_v31 = vpop.f32.mrf.mxu3 }
 0x19e   : > { %v874_v8 = vmax.f32 %v2049_v30, 0.0  ;;  %v875_v9 = vmax.f32 %v2051_v31, 0.0  ;;  %v895_v30 = vld [vmem:[#allocation2 + $0x78] sm:$0xff]  ;;  %v1145_v31 = vld [vmem:[%s2307_s5 + $0x40] sm:$0xff] }
 0x19f   : > { %1173 = vperm.xlu2 %1689, %v1142_v29  }
 0x1a1   : > { %v714_v32 = vpop.f32.mrf.mxu0  ;;  %v758_v33 = vpop.f32.mrf.mxu1 }
 0x1a2   : > { %v880_v38 = vmax.f32 %v714_v32, 0.0  ;;  %v881_v39 = vmax.f32 %v758_v33, 0.0  ;;  %v896_v32 = vld [vmem:[#allocation2 + $0x80] sm:$0xff]  ;;  %v897_v33 = vld [vmem:[#allocation2 + $0x88] sm:$0xff] }
 0x1a5   : > { %v2053_v34 = vpop.f32.mrf.mxu2  ;;  %v2055_v35 = vpop.f32.mrf.mxu3 }
 0x1a6   : > { %v878_v3 = vmax.f32 %v2053_v34, 0.0  ;;  %v879_v4 = vmax.f32 %v2055_v35, 0.0 }
 0x1a7   : > { %1188 = vperm.xlu2 %1689, %v1145_v31  }
 0x1a9   : > { %v717_v36 = vpop.f32.mrf.mxu0  ;;  %v761_v37 = vpop.f32.mrf.mxu1 }
 0x1aa   : > { %v884_v40 = vmax.f32 %v717_v36, 0.0  ;;  %v885_v41 = vmax.f32 %v761_v37, 0.0 }
 0x1ac   : > { %932 = vmatpush.msrb.mxu0 %v884_v40  ;;  %976 = vmatpush.msrb.mxu1 %v885_v41 }
 0x1ad   : > { %v802_v43 = vpop.f32.mrf.mxu2  ;;  %v846_v44 = vpop.f32.mrf.mxu3 }
 0x1ae   : > { %933 = vmatpush.msrb.mxu0 %v880_v38  ;;  %977 = vmatpush.msrb.mxu1 %v881_v39  ;;  %v882_v62 = vmax.f32 %v802_v43, 0.0  ;;  %v883_v63 = vmax.f32 %v846_v44, 0.0 }
 0x1b0   : > { %934 = vmatpush.msrb.mxu0 %v876_v42  ;;  %978 = vmatpush.msrb.mxu1 %v877_v45 }
 0x1b2   : > { %935 = vmatpush.msrb.mxu0 %v872_v46  ;;  %979 = vmatpush.msrb.mxu1 %v873_v47 }
 0x1b4   : > { %936 = vmatpush.msrb.mxu0 %v868_v48  ;;  %980 = vmatpush.msrb.mxu1 %v869_v49 }
 0x1b5   : > { %v805_v53 = vpop.f32.mrf.mxu2  ;;  %v849_v54 = vpop.f32.mrf.mxu3 }
 0x1b6   : > { %v886_v58 = vmax.f32 %v805_v53, 0.0  ;;  %v887_v59 = vmax.f32 %v849_v54, 0.0  ;;  %937 = vmatpush.msrb.mxu0 %v864_v50  ;;  %981 = vmatpush.msrb.mxu1 %v865_v51  ;;  %v2152_v50 = vpop.permute.xlu0 %1148 }
 0x1b8   : > { %938 = vmatpush.msrb.mxu0 %v860_v56  ;;  %982 = vmatpush.msrb.mxu1 %v861_v57 }
 0x1b9   : > { %1020 = vmatpush.msrb.mxu2 %v886_v58  ;;  %1064 = vmatpush.msrb.mxu3 %v887_v59 }
 0x1ba   : > { %939 = vmatpush.msrb.mxu0 %v856_v60  ;;  %983 = vmatpush.msrb.mxu1 %v857_v61 }
 0x1bb   : > { %1021 = vmatpush.msrb.mxu2 %v882_v62  ;;  %1065 = vmatpush.msrb.mxu3 %v883_v63 }
 0x1bc   : > { %940 = vmatpush.msrb.mxu0 %v852_v1  ;;  %984 = vmatpush.msrb.mxu1 %v853_v2 }
 0x1bd   : > { %1022 = vmatpush.msrb.mxu2 %v878_v3  ;;  %1066 = vmatpush.msrb.mxu3 %v879_v4 }
 0x1be   : > { %1597 = vmatmul.msk.f32.vlgmr.msrb.gmra.mxu1 %vm648_vm7, %v889_v5  ;;  %1588 = vmatmul.msk.f32.vlgmr.msrb.gmra.mxu0 %vm648_vm7, %v889_v5 }
 0x1bf   : > { %1023 = vmatpush.msrb.mxu2 %v874_v8  ;;  %1067 = vmatpush.msrb.mxu3 %v875_v9 }
 0x1c1   : > { %1024 = vmatpush.msrb.mxu2 %v870_v12  ;;  %1068 = vmatpush.msrb.mxu3 %v871_v13 }
 0x1c3   : > { %1025 = vmatpush.msrb.mxu2 %v866_v16  ;;  %1069 = vmatpush.msrb.mxu3 %v867_v17 }
 0x1c5   : > { %1026 = vmatpush.msrb.mxu2 %v862_v20  ;;  %1070 = vmatpush.msrb.mxu3 %v863_v21 }
 0x1c6   : > { %1598 = vmatmul.msk.f32.gmra.mxu1 %vm648_vm7, %v890_v24  ;;  %1589 = vmatmul.msk.f32.gmra.mxu0 %vm648_vm7, %v890_v24 }
 0x1c7   : > { %1027 = vmatpush.msrb.mxu2 %v858_v25  ;;  %1071 = vmatpush.msrb.mxu3 %v859_v26 }
 0x1c9   : > { %1028 = vmatpush.msrb.mxu2 %v854_v18  ;;  %1072 = vmatpush.msrb.mxu3 %v855_v19 }
 0x1ca   : > { %1606 = vmatmul.msk.f32.vlgmr.msrb.gmra.mxu2 %vm648_vm7, %v889_v5  ;;  %1615 = vmatmul.msk.f32.vlgmr.msrb.gmra.mxu3 %vm648_vm7, %v889_v5 }
 0x1ce   : > { %1599 = vmatmul.msk.f32.gmra.mxu1 %vm648_vm7, %v891_v14  ;;  %1590 = vmatmul.msk.f32.gmra.mxu0 %vm648_vm7, %v891_v14 }
 0x1d2   : > { %1607 = vmatmul.msk.f32.gmra.mxu2 %vm648_vm7, %v890_v24  ;;  %1616 = vmatmul.msk.f32.gmra.mxu3 %vm648_vm7, %v890_v24 }
 0x1d6   : > { %1600 = vmatmul.msk.f32.gmra.mxu1 %vm648_vm7, %v892_v10  ;;  %1591 = vmatmul.msk.f32.gmra.mxu0 %vm648_vm7, %v892_v10 }
 0x1da   : > { %1608 = vmatmul.msk.f32.gmra.mxu2 %vm648_vm7, %v891_v14  ;;  %1617 = vmatmul.msk.f32.gmra.mxu3 %vm648_vm7, %v891_v14 }
 0x1dd   : > { %v2154_v53 = vpop.permute.xlu1 %1158  ;;  %v2162_v61 = vpop.permute.xlu0 %1153 }
 0x1de   : > { %1601 = vmatmul.msk.f32.gmra.mxu1 %vm648_vm7, %v893_v15  ;;  %1592 = vmatmul.msk.f32.gmra.mxu0 %vm648_vm7, %v893_v15 }
 0x1e2   : > { %1609 = vmatmul.msk.f32.gmra.mxu2 %vm648_vm7, %v892_v10  ;;  %1618 = vmatmul.msk.f32.gmra.mxu3 %vm648_vm7, %v892_v10 }
 0x1e6   : > { %1602 = vmatmul.msk.f32.gmra.mxu1 %vm648_vm7, %v894_v28  ;;  %1593 = vmatmul.msk.f32.gmra.mxu0 %vm648_vm7, %v894_v28 }
 0x1ea   : > { %1610 = vmatmul.msk.f32.gmra.mxu2 %vm648_vm7, %v893_v15  ;;  %1619 = vmatmul.msk.f32.gmra.mxu3 %vm648_vm7, %v893_v15 }
 0x1ee   : > { %1603 = vmatmul.msk.f32.gmra.mxu1 %vm648_vm7, %v895_v30  ;;  %1594 = vmatmul.msk.f32.gmra.mxu0 %vm648_vm7, %v895_v30 }
 0x1f1   : > { %v2160_v60 = vpop.permute.xlu2 %1168 }
 0x1f2   : > { %1611 = vmatmul.msk.f32.gmra.mxu2 %vm648_vm7, %v894_v28  ;;  %1620 = vmatmul.msk.f32.gmra.mxu3 %vm648_vm7, %v894_v28 }
 0x1f6   : > { %1604 = vmatmul.msk.f32.gmra.mxu1 %vm648_vm7, %v896_v32  ;;  %1595 = vmatmul.msk.f32.gmra.mxu0 %vm648_vm7, %v896_v32 }
 0x1f9   : > { %v2178_v10 = vpop.permute.xlu2 %1173 }
 0x1fa   : > { %1612 = vmatmul.msk.f32.gmra.mxu2 %vm648_vm7, %v895_v30  ;;  %1621 = vmatmul.msk.f32.gmra.mxu3 %vm648_vm7, %v895_v30 }
 0x1fe   : > { %1605 = vmatmul.msk.f32.gmra.mxu1 %vm648_vm7, %v897_v33  ;;  %1596 = vmatmul.msk.f32.gmra.mxu0 %vm648_vm7, %v897_v33  ;;  %v2182_v31 = vpop.permute.xlu0 %1178 }
 0x201   : > { %v2173_v17 = vpop.permute.xlu1 %1163 }
 0x202   : > { %1613 = vmatmul.msk.f32.gmra.mxu2 %vm648_vm7, %v896_v32  ;;  %1622 = vmatmul.msk.f32.gmra.mxu3 %vm648_vm7, %v896_v32 }
 0x20a   : > { %1614 = vmatmul.msk.f32.gmra.mxu2 %vm648_vm7, %v897_v33  ;;  %1623 = vmatmul.msk.f32.gmra.mxu3 %vm648_vm7, %v897_v33 }
 0x23b   : > { %v986_v34 = vpop.f32.mrf.mxu1  ;;  %v942_v35 = vpop.f32.mrf.mxu0 }
 0x23c   : > { %v1101_v54 = vmax.f32 %v942_v35, 0.0  ;;  %v1102_v58 = vmax.f32 %v986_v34, 0.0 }
 0x23e   : > { %v1191_v63 = vmul.f32 %v2152_v50, %v1101_v54  ;;  %v1192_v3 = vmul.f32 %v2152_v50, %v1102_v58 }
 0x243   : > { %v989_v36 = vpop.f32.mrf.mxu1  ;;  %v945_v37 = vpop.f32.mrf.mxu0 }
 0x244   : > { %v1105_v55 = vmax.f32 %v945_v37, 0.0  ;;  %v1106_v59 = vmax.f32 %v989_v36, 0.0 }
 0x246   : > { %v1195_v1 = vmul.f32 %v2162_v61, %v1105_v55  ;;  %v1196_v8 = vmul.f32 %v2162_v61, %v1106_v59 }
 0x248   : > { %v1227_v16 = vadd.f32 %v1195_v1, %v1191_v63  ;;  %v1241_v21 = vadd.f32 %v1196_v8, %v1192_v3 }
 0x24b   : > { %v992_v38 = vpop.f32.mrf.mxu1  ;;  %v948_v39 = vpop.f32.mrf.mxu0 }
 0x24c   : > { %v1109_v62 = vmax.f32 %v948_v39, 0.0  ;;  %v1110_v2 = vmax.f32 %v992_v38, 0.0 }
 0x24d   : > { %v2140_v40 = vpop.f32.mrf.mxu2  ;;  %v2142_v41 = vpop.f32.mrf.mxu3 }
 0x24e   : > { %v1199_v13 = vmul.f32 %v2154_v53, %v1109_v62  ;;  %v1200_v20 = vmul.f32 %v2154_v53, %v1110_v2  ;;  %v2197_v62 = vpop.permute.xlu2 %1188  ;;  %v1103_v63 = vmax.f32 %v2140_v40, 0.0 }
 0x250   : > { %v1228_v18 = vadd.f32 %v1227_v16, %v1199_v13  ;;  %v1242_v11 = vadd.f32 %v1241_v21, %v1200_v20 }
 0x253   : > { %v995_v42 = vpop.f32.mrf.mxu1  ;;  %v951_v43 = vpop.f32.mrf.mxu0 }
 0x254   : > { %v1114_v9 = vmax.f32 %v995_v42, 0.0  ;;  %v1113_v6 = vmax.f32 %v951_v43, 0.0  ;;  %v2190_v42 = vpop.permute.xlu1 %1183 }
 0x255   : > { %v2144_v44 = vpop.f32.mrf.mxu2  ;;  %v2146_v45 = vpop.f32.mrf.mxu3 }
 0x256   : > { %v1203_v26 = vmul.f32 %v2173_v17, %v1113_v6  ;;  %v1204_v22 = vmul.f32 %v2173_v17, %v1114_v9  ;;  %v1108_v1 = vmax.f32 %v2146_v45, 0.0 }
 0x258   : > { %v1229_v34 = vadd.f32 %v1228_v18, %v1203_v26  ;;  %v1243_v35 = vadd.f32 %v1242_v11, %v1204_v22 }
 0x25b   : > { %v998_v46 = vpop.f32.mrf.mxu1  ;;  %v954_v47 = vpop.f32.mrf.mxu0 }
 0x25c   : > { %v1118_v24 = vmax.f32 %v998_v46, 0.0  ;;  %v1117_v25 = vmax.f32 %v954_v47, 0.0 }
 0x25d   : > { %v2148_v48 = vpop.f32.mrf.mxu2  ;;  %v2150_v49 = vpop.f32.mrf.mxu3 }
 0x25e   : > { %v1207_v28 = vmul.f32 %v2160_v60, %v1117_v25  ;;  %v1208_v29 = vmul.f32 %v2160_v60, %v1118_v24  ;;  %v1111_v6 = vmax.f32 %v2148_v48, 0.0  ;;  %v1112_v13 = vmax.f32 %v2150_v49, 0.0 }
 0x25f   : > { %v1193_v48 = vmul.f32 %v2152_v50, %v1103_v63 }
 0x260   : > { %v1230_v47 = vadd.f32 %v1229_v34, %v1207_v28  ;;  %v1201_v11 = vmul.f32 %v2154_v53, %v1111_v6 }
 0x263   : > { %v1001_v51 = vpop.f32.mrf.mxu1  ;;  %v957_v52 = vpop.f32.mrf.mxu0 }
 0x264   : > { %v1122_v19 = vmax.f32 %v1001_v51, 0.0  ;;  %v1121_v14 = vmax.f32 %v957_v52, 0.0  ;;  %v1244_v51 = vadd.f32 %v1243_v35, %v1208_v29  ;;  %v1107_v52 = vmax.f32 %v2144_v44, 0.0 }
 0x265   : > { %v2156_v56 = vpop.f32.mrf.mxu2  ;;  %v2158_v57 = vpop.f32.mrf.mxu3  ;;  %v1104_v44 = vmax.f32 %v2142_v41, 0.0  ;;  %v1198_v41 = vmul.f32 %v2162_v61, %v1108_v1 }
 0x266   : > { %v1211_v37 = vmul.f32 %v2178_v10, %v1121_v14  ;;  %v1212_v38 = vmul.f32 %v2178_v10, %v1122_v19  ;;  %v1197_v16 = vmul.f32 %v2162_v61, %v1107_v52  ;;  %v1115_v26 = vmax.f32 %v2156_v56, 0.0 }
 0x267   : > { %v1116_v22 = vmax.f32 %v2158_v57, 0.0  ;;  %v1194_v19 = vmul.f32 %v2152_v50, %v1104_v44 }
 0x268   : > { %v1231_v54 = vadd.f32 %v1230_v47, %v1211_v37  ;;  %v1245_v55 = vadd.f32 %v1244_v51, %v1212_v38  ;;  %v1205_v29 = vmul.f32 %v2173_v17, %v1115_v26 }
 0x269   : > { %v1269_v57 = vadd.f32 %v1198_v41, %v1194_v19 }
 0x26b   : > { %v1004_v4 = vpop.f32.mrf.mxu1  ;;  %v960_v5 = vpop.f32.mrf.mxu0 }
 0x26c   : > { %v1126_v27 = vmax.f32 %v1004_v4, 0.0  ;;  %v1125_v30 = vmax.f32 %v960_v5, 0.0 }
 0x26d   : > { %v2168_v7 = vpop.f32.mrf.mxu2  ;;  %v2170_v12 = vpop.f32.mrf.mxu3 }
 0x26e   : > { %v1215_v43 = vmul.f32 %v2182_v31, %v1125_v30  ;;  %v1216_v46 = vmul.f32 %v2182_v31, %v1126_v27  ;;  %v1119_v14 = vmax.f32 %v2168_v7, 0.0  ;;  %v1255_v27 = vadd.f32 %v1197_v16, %v1193_v48 }
 0x26f   : > { %v1206_v30 = vmul.f32 %v2173_v17, %v1116_v22 }
 0x270   : > { %v1232_v4 = vadd.f32 %v1231_v54, %v1215_v43  ;;  %v1246_v5 = vadd.f32 %v1245_v55, %v1216_v46  ;;  %v1209_v35 = vmul.f32 %v2160_v60, %v1119_v14 }
 0x273   : > { %v1007_v15 = vpop.f32.mrf.mxu1  ;;  %v963_v23 = vpop.f32.mrf.mxu0 }
 0x274   : > { %v1130_v36 = vmax.f32 %v1007_v15, 0.0  ;;  %v1129_v39 = vmax.f32 %v963_v23, 0.0  ;;  %v1202_v15 = vmul.f32 %v2154_v53, %v1112_v13  ;;  %v1120_v23 = vmax.f32 %v2170_v12, 0.0 }
 0x275   : > { %v2184_v32 = vpop.f32.mrf.mxu2  ;;  %v2186_v33 = vpop.f32.mrf.mxu3 }
 0x276   : > { %v1219_v58 = vmul.f32 %v2190_v42, %v1129_v39  ;;  %v1220_v59 = vmul.f32 %v2190_v42, %v1130_v36  ;;  %v1123_v61 = vmax.f32 %v2184_v32, 0.0  ;;  %v1124_v50 = vmax.f32 %v2186_v33, 0.0 }
 0x277   : > { %v1256_v36 = vadd.f32 %v1255_v27, %v1201_v11  ;;  %v1270_v53 = vadd.f32 %v1269_v57, %v1202_v15  ;;  %v1210_v39 = vmul.f32 %v2160_v60, %v1120_v23 }
 0x278   : > { %v1233_v24 = vadd.f32 %v1232_v4, %v1219_v58  ;;  %v1247_v40 = vadd.f32 %v1246_v5, %v1220_v59  ;;  %v1213_v17 = vmul.f32 %v2178_v10, %v1123_v61  ;;  %v1214_v33 = vmul.f32 %v2178_v10, %v1124_v50 }
 0x279   : > { %v1257_v47 = vadd.f32 %v1256_v36, %v1205_v29  ;;  %v1271_v51 = vadd.f32 %v1270_v53, %v1206_v30 }
 0x27b   : > { %v1010_v2 = vpop.f32.mrf.mxu1  ;;  %v966_v3 = vpop.f32.mrf.mxu0  ;;  %v1258_v63 = vadd.f32 %v1257_v47, %v1209_v35 }
 0x27c   : > { %v1134_v8 = vmax.f32 %v1010_v2, 0.0  ;;  %v1133_v9 = vmax.f32 %v966_v3, 0.0  ;;  %v1272_v2 = vadd.f32 %v1271_v51, %v1210_v39 }
 0x27d   : > { %v1048_v20 = vpop.f32.mrf.mxu2  ;;  %v1092_v21 = vpop.f32.mrf.mxu3  ;;  %v1259_v4 = vadd.f32 %v1258_v63, %v1213_v17 }
 0x27e   : > { %v1224_v45 = vmul.f32 %v2197_v62, %v1134_v8  ;;  %v1223_v25 = vmul.f32 %v2197_v62, %v1133_v9  ;;  %v1127_v37 = vmax.f32 %v1048_v20, 0.0  ;;  %v1128_v43 = vmax.f32 %v1092_v21, 0.0 }
 0x27f   : > { %v1273_v8 = vadd.f32 %v1272_v2, %v1214_v33 }
 0x280   : > { %v1248_v18 = vadd.f32 %v1247_v40, %v1224_v45  ;;  %v1234_v49 = vadd.f32 %v1233_v24, %v1223_v25  ;;  %v1217_v59 = vmul.f32 %v2182_v31, %v1127_v37  ;;  %v1218_v1 = vmul.f32 %v2182_v31, %v1128_v43 }
 0x282   : > { %v1249_v56 = vrot.slane %v1248_v18, 4  ;;  %v1235_v28 = vrot.slane %v1234_v49, 4  ;;  %v1260_v10 = vadd.f32 %v1259_v4, %v1217_v59  ;;  %v1274_v20 = vadd.f32 %v1273_v8, %v1218_v1 }
 0x284   : > { %v1250_v34 = vadd.f32 %v1249_v56, %v1248_v18  ;;  %v1236_v7 = vadd.f32 %v1235_v28, %v1234_v49 }
 0x285   : > { %v1051_v12 = vpop.f32.mrf.mxu2  ;;  %v1095_v38 = vpop.f32.mrf.mxu3 }
 0x286   : > { %v1251_v46 = vrot.slane %v1250_v34, 2  ;;  %v1237_v32 = vrot.slane %v1236_v7, 2  ;;  %v1131_v52 = vmax.f32 %v1051_v12, 0.0  ;;  %v1132_v58 = vmax.f32 %v1095_v38, 0.0 }
 0x288   : > { %v1252_v54 = vadd.f32 %v1251_v46, %v1250_v34  ;;  %v1238_v55 = vadd.f32 %v1237_v32, %v1236_v7  ;;  %v1221_v5 = vmul.f32 %v2190_v42, %v1131_v52  ;;  %v1222_v6 = vmul.f32 %v2190_v42, %v1132_v58 }
 0x28a   : > { %v1253_v60 = vrot.slane %v1252_v54, 1  ;;  %v1239_v3 = vrot.slane %v1238_v55, 1  ;;  %v1261_v31 = vadd.f32 %v1260_v10, %v1221_v5  ;;  %v1275_v25 = vadd.f32 %v1274_v20, %v1222_v6 }
 0x28c   : > { %v1254_v9 = vadd.f32 %v1253_v60, %v1252_v54  ;;  %v1240_v44 = vadd.f32 %v1239_v3, %v1238_v55 }
 0x28d   : > { %v1054_v13 = vpop.f32.mrf.mxu2  ;;  %v1098_v16 = vpop.f32.mrf.mxu3 }
 0x28e   : > { %v1625_v21 = vmul.f32 -1.442695, %v1254_v9  ;;  %v1135_v24 = vmax.f32 %v1054_v13, 0.0  ;;  %v1136_v40 = vmax.f32 %v1098_v16, 0.0  ;;  %v1624_v45 = vmul.f32 -1.442695, %v1240_v44 }
 0x290   : > { %1690 = vpow2.f32 %v1625_v21  ;;  %v1225_v26 = vmul.f32 %v2197_v62, %v1135_v24  ;;  %v1226_v22 = vmul.f32 %v2197_v62, %v1136_v40 }
 0x291   : > { %1692 = vpow2.f32 %v1624_v45 }
 0x292   : > { %v1262_v41 = vadd.f32 %v1261_v31, %v1225_v26  ;;  %v1276_v48 = vadd.f32 %v1275_v25, %v1226_v22 }
 0x294   : > { %v1263_v18 = vrot.slane %v1262_v41, 4  ;;  %v1277_v42 = vrot.slane %v1276_v48, 4 }
 0x296   : > { %v1691_v49 = vpop.eup %1690  ;;  %v1264_v19 = vadd.f32 %v1263_v18, %v1262_v41  ;;  %v1278_v14 = vadd.f32 %v1277_v42, %v1276_v48 }
 0x297   : > { %v1296_v11 = vadd.f32 1.0, %v1691_v49  ;;  %v1693_v27 = vpop.eup %1692 }
 0x298   : > { %v1265_v15 = vrot.slane %v1264_v19, 2  ;;  %v1279_v23 = vrot.slane %v1278_v14, 2  ;;  %v2230_v57 = vadd.f32 1.0, %v1693_v27 }
 0x299   : > { %1694 = vrcp.f32 %v1296_v11  ;;  %v1325_v47 = vand.u32 2147483648, %v1296_v11  ;;  %vm1319_vm9 = vweird.f32 %v1296_v11  ;;  %v1323_v58 = vand.u32 2147483647, %v1296_v11 }
 0x29a   : > { %v1266_v56 = vadd.f32 %v1265_v15, %v1264_v19  ;;  %v1280_v28 = vadd.f32 %v1279_v23, %v1278_v14  ;;  %1696 = vrcp.f32 %v2230_v57  ;;  %vm1304_vm10 = vweird.f32 %v2230_v57 }
 0x29b   : > { %v1326_v1 = vor.u32 1.1754944e-38, %v1325_v47  ;;  %vm1324_vm15 = vcmp.eq.f32.partialorder %v1323_v58, 8.507059e+37  ;;  %v1310_v13 = vand.u32 2147483648, %v2230_v57  ;;  %v1308_v21 = vand.u32 2147483647, %v2230_v57 }
 0x29c   : > { %v1267_v61 = vrot.slane %v1266_v56, 1  ;;  %v1281_v29 = vrot.slane %v1280_v28, 1 }
 0x29d   : > { %v1311_v48 = vor.u32 1.1754944e-38, %v1310_v13 }
 0x29e   : > { %v1268_v62 = vadd.f32 %v1267_v61, %v1266_v56  ;;  %v1282_v30 = vadd.f32 %v1281_v29, %v1280_v28 }
 0x29f   : > { %v1695_v7 = vpop.eup %1694 }
 0x2a0   : > { %v1626_v50 = vmul.f32 -1.442695, %v1268_v62  ;;  %v1627_v34 = vmul.f32 -1.442695, %v1282_v30  ;;  %v1315_v35 = vmul.f32 %v1695_v7, %v1296_v11  ;;  %v2233_v36 = vpop.eup %1696  ;;  %vm1320_vm8 = vweird.f32 %v1695_v7 }
 0x2a1   : > { %v1300_v38 = vmul.f32 %v2233_v36, %v2230_v57  ;;  %vm1305_vm11 = vweird.f32 %v2233_v36  ;;  %vm2241_vm12 = vmor %vm1319_vm9, %vm1320_vm8  ;;  %vm1368_vm8 = vcmask 1042434   ;;  %vm1309_vm9 = vcmp.eq.f32.partialorder %v1308_v21, 8.507059e+37 }
 0x2a2   : > { %1698 = vpow2.f32 %v1626_v50  ;;  %v1316_v12 = vsub.f32 1.0, %v1315_v35  ;;  %vm2256_vm1 = vmor %vm1304_vm10, %vm1305_vm11  ;;  %vm1370_vm10 = vcmask 1041408   ;;  %vm1375_vm11 = vcmp.lt.s32.totalorder %v286_v0, 512 }
 0x2a3   : > { %1700 = vpow2.f32 %v1627_v34  ;;  %v1301_v46 = vsub.f32 1.0, %v1300_v38 }
 0x2a4   : > { %v1317_v32 = vmul.f32 %v1695_v7, %v1316_v12 }
 0x2a5   : > { %v1302_v17 = vmul.f32 %v2233_v36, %v1301_v46 }
 0x2a6   : > { %v1318_v52 = vadd.f32 %v1695_v7, %v1317_v32 }
 0x2a7   : > { %v1303_v60 = vadd.f32 %v2233_v36, %v1302_v17 }
 0x2a8   : > { %v1699_v53 = vpop.eup %1698  ;;  %v1322_v3 = vsel %vm2241_vm12, %v1695_v7, %v1318_v52 }
 0x2a9   : > { %v1701_v37 = vpop.eup %1700  ;;  %v1297_v39 = vadd.f32 1.0, %v1699_v53  ;;  %v1327_v16 = vsel %vm1324_vm15, %v1326_v1, %v1322_v3  ;;  %v1307_v45 = vsel %vm2256_vm1, %v2233_v36, %v1303_v60 }
 0x2aa   : > { %v1298_v43 = vadd.f32 1.0, %v1701_v37  ;;  %v1363_v41 = vrot.slane %v1327_v16, 7  ;;  %v1312_v19 = vsel %vm1309_vm9, %v1311_v48, %v1307_v45 }
 0x2ab   : > { %1702 = vrcp.f32 %v1297_v39  ;;  %v1340_v4 = vand.u32 2147483648, %v1297_v39  ;;  %v1338_v8 = vand.u32 2147483647, %v1297_v39  ;;  %vm1334_vm2 = vweird.f32 %v1297_v39 }
 0x2ac   : > { %1704 = vrcp.f32 %v1298_v43  ;;  %v1355_v9 = vand.u32 2147483648, %v1298_v43  ;;  %v1353_v6 = vand.u32 2147483647, %v1298_v43  ;;  %vm1349_vm4 = vweird.f32 %v1298_v43 }
 0x2ad   : > { %v1341_v24 = vor.u32 1.1754944e-38, %v1340_v4  ;;  %vm1339_vm5 = vcmp.eq.f32.partialorder %v1338_v8, 8.507059e+37  ;;  %v1367_v14 = vsel %vm1366_vm13, %v1312_v19, %v1363_v41 }
 0x2ae   : > { %v1356_v25 = vor.u32 1.1754944e-38, %v1355_v9  ;;  %vm1354_vm7 = vcmp.eq.f32.partialorder %v1353_v6, 8.507059e+37 }
 0x2b1   : > { %v1703_v51 = vpop.eup %1702 }
 0x2b2   : > { %v1705_v33 = vpop.eup %1704  ;;  %v1330_v54 = vmul.f32 %v1703_v51, %v1297_v39  ;;  %vm1335_vm14 = vweird.f32 %v1703_v51 }
 0x2b3   : > { %v1345_v55 = vmul.f32 %v1705_v33, %v1298_v43  ;;  %vm1350_vm0 = vweird.f32 %v1705_v33  ;;  %vm1336_vm3 = vmor %vm1334_vm2, %vm1335_vm14 }
 0x2b4   : > { %v1331_v59 = vsub.f32 1.0, %v1330_v54  ;;  %vm1351_vm6 = vmor %vm1349_vm4, %vm1350_vm0 }
 0x2b5   : > { %v1346_v2 = vsub.f32 1.0, %v1345_v55 }
 0x2b6   : > { %v1332_v5 = vmul.f32 %v1703_v51, %v1331_v59 }
 0x2b7   : > { %v1347_v44 = vmul.f32 %v1705_v33, %v1346_v2 }
 0x2b8   : > { %v1333_v20 = vadd.f32 %v1703_v51, %v1332_v5 }
 0x2b9   : > { %v1348_v40 = vadd.f32 %v1705_v33, %v1347_v44 }
 0x2ba   : > { %v1337_v31 = vsel %vm1336_vm3, %v1703_v51, %v1333_v20 }
 0x2bb   : > { %v1342_v26 = vsel %vm1339_vm5, %v1341_v24, %v1337_v31  ;;  %v1352_v22 = vsel %vm1351_vm6, %v1705_v33, %v1348_v40 }
 0x2bc   : > { %v1357_v18 = vsel %vm1354_vm7, %v1356_v25, %v1352_v22  ;;  %v1364_v42 = vrot.slane %v1342_v26, 6 }
 0x2bd   : > { %v1365_v49 = vrot.slane %v1357_v18, 5 }
 0x2bf   : > { %v1369_v11 = vsel %vm1368_vm8, %v1364_v42, %v1365_v49 }
 0x2c0   : > { %v1371_v15 = vsel %vm1370_vm10, %v1367_v14, %v1369_v11 }
 0x2c1   : > { %1377 = vst.msk [vmem:[%s274_s18] sm:$0xf] %vm1375_vm11, %v1371_v15 }
 0x2c2   : > { %1763 = shalt.err (!%p1760_p8)
}
 0x2c3   : > { %1636 = dma.vmem_to_hbm [thread:$0]  (%p1883_p5), %s1392_s16, 64, %s1394_s19, %s1379_s20  }
 0x2c4 PF: > { %p1648_p9 = scmp.ge.s32.totalorder %s1802_s24, 2  ;;  %s1405_s12 = sand.u32 1, %s1790_s21  }
 0x2c5   : > { %s1406_s13 = scalar_lea.sflag [#allocation4], %s1405_s12 }
 0x2c6   : > { %p1643_p10 = pnand %p1648_p9, %p1887_p6 }
 0x2c8   : > { %p1644_p11 = pneg %p1643_p10 }
 0x2ca   : > { %1785 = dma.done.wait (%p1644_p11), %s1406_s13, 64  }
 0x2cb   : > { %1787 = vsyncadd (%p1644_p11), %s1406_s13, 4294967232  ;;  %p17_p12 = scmp.ge.s32.totalorder %s1870_s27, 4   ;;  %s2315_s21 = smov %s1794_s22 }
 0x2cc   : > { %s2316_s22 = smov %s1798_s23  ;;  %s2317_s23 = smov %s1881_s30 }
 0x2cd   : > { %s2318_s24 = smov %s1870_s27  ;;  %19 = sbr.rel (!%p17_p12) target bundleno = 4 (0x4), region = 88 }
 0x2d2   :  { %1412 = vsyncpa [#allocation3], 1 }
 0x2d3   :  { %1414 = vsyncpa [#allocation3 + $0x1], 1 }
 0x2d4   :  { %1415 = vsyncpa [#allocation4], 1 }
 0x2d5   :  { %1417 = vsyncpa [#allocation4 + $0x1], 1 }

</bundles_post_ra>
